<compile_context>
chip_gen: v6e
topology: v6e:2x2x1
jax: 0.10.0
libtpu: 0.0.40
codegen_flags: <defaults>
</compile_context>

<pallas_src>
import functools
import math

import jax
import jax.numpy as jnp
from jax.experimental import pallas as pl
from jax.experimental.pallas import tpu as pltpu

# ---------------- small synthetic BERT config ----------------
VOCAB = 100
MAX_POS = 32
HIDDEN = 32
HEADS = 2
HEAD_DIM = HIDDEN // HEADS
LAYERS = 2
INTERMEDIATE = 64
N_CLASSES = 3
LANE_PAD = 128          # lane-dense output width for the classifier head
LN_EPS = 1e-12


# ---------------- in-kernel helpers (all f32 elementwise) ----------------

def _layer_norm(x, g, b):
    mu = jnp.mean(x, axis=-1, keepdims=True)
    d = x - mu
    var = jnp.mean(d * d, axis=-1, keepdims=True)
    return d * jax.lax.rsqrt(var + LN_EPS) * g + b


def _gelu(x):
    # TODO(synk): BERT uses exact erf-GELU; tanh approximation used here.
    c = math.sqrt(2.0 / math.pi)
    return 0.5 * x * (1.0 + jnp.tanh(c * (x + 0.044715 * x * x * x)))


# ---------------- single fused Pallas kernel ----------------

def _fused_bert_kernel(emb_ref, bias_ref, sel_ref,
                       emb_g_ref, emb_b_ref,
                       qkv_w_ref, qkv_b_ref,
                       ao_w_ref, ao_b_ref,
                       ln1_g_ref, ln1_b_ref,
                       i_w_ref, i_b_ref,
                       o_w_ref, o_b_ref,
                       ln2_g_ref, ln2_b_ref,
                       pool_w_ref, pool_b_ref,
                       fc_w_ref, fc_b_ref,
                       out_ref):
    """Whole BERT encoder + pooler + fc head; everything resident in VMEM."""
    # ---- embedding LayerNorm (LN-only: no zero residual tensor) ----
    h = _layer_norm(emb_ref[...], emb_g_ref[...], emb_b_ref[...])   # (B*S, H) f32
    # combined block-diagonal (batch separation) + key-padding additive bias,
    # built once in the wrapper and reused by every layer / head
    bias = bias_ref[...]                                            # (B*S, B*S) f32

    # ---- encoder layers (LAYERS is tiny & static -> unrolled Python loop) ----
    for l in range(LAYERS):
        # fused Q|K|V projection (scale already folded into Q weights/bias)
        qkv = jnp.dot(h.astype(jnp.bfloat16), qkv_w_ref[l],
                      preferred_element_type=jnp.float32) + qkv_b_ref[l]  # (B*S, 3H)
        ao_w = ao_w_ref[l]                                          # (H, H) bf16

        acc = jnp.zeros(h.shape, jnp.float32)
        for hh in range(HEADS):
            c0 = hh * HEAD_DIM
            q = qkv[:, c0:c0 + HEAD_DIM]                                    # (B*S, Dh)
            k = qkv[:, HIDDEN + c0:HIDDEN + c0 + HEAD_DIM]                  # (B*S, Dh)
            v = qkv[:, 2 * HIDDEN + c0:2 * HIDDEN + c0 + HEAD_DIM]          # (B*S, Dh)
            # batched-over-everything score matmul; batch separation lives in `bias`
            s = jnp.einsum("qd,kd->qk", q, k,
                           preferred_element_type=jnp.float32) + bias       # (B*S, B*S)
            s = s - jnp.max(s, axis=-1, keepdims=True)
            p = jnp.exp(s)
            p = p * pl.reciprocal(jnp.sum(p, axis=-1, keepdims=True),
                                  approx=True)
            ctx = jnp.dot(p, v, preferred_element_type=jnp.float32)         # (B*S, Dh)
            # fold the head-concat into the attention output projection
            acc = acc + jnp.dot(ctx.astype(jnp.bfloat16),
                                ao_w[c0:c0 + HEAD_DIM, :],
                                preferred_element_type=jnp.float32)
        attn_out = acc + ao_b_ref[l]                                         # (B*S, H)
        h = _layer_norm(attn_out + h, ln1_g_ref[l], ln1_b_ref[l])

        inter = _gelu(jnp.dot(h.astype(jnp.bfloat16), i_w_ref[l],
                              preferred_element_type=jnp.float32) + i_b_ref[l])
        ffn = jnp.dot(inter.astype(jnp.bfloat16), o_w_ref[l],
                      preferred_element_type=jnp.float32) + o_b_ref[l]
        h = _layer_norm(ffn + h, ln2_g_ref[l], ln2_b_ref[l])

    # ---- pooler + fc head, CLS rows only ----
    # Selection matmul pulls the B CLS rows into a (B_pad, H) slab (no strided
    # gather, no concat); output is written as a lane-dense (B_pad, 128) slab.
    h_cls = jnp.dot(sel_ref[...], h.astype(jnp.bfloat16),
                    preferred_element_type=jnp.float32)                     # (B_pad, H)
    pooled = jnp.tanh(jnp.dot(h_cls.astype(jnp.bfloat16), pool_w_ref[...],
                              preferred_element_type=jnp.float32) + pool_b_ref[...])
    logits = jnp.dot(pooled.astype(jnp.bfloat16), fc_w_ref[...],
                     preferred_element_type=jnp.float32) + fc_b_ref[...]     # (B_pad, 128)
    out_ref[...] = logits


# ---------------- parameter init (deterministic, synthetic) ----------------

def init_params(key):
    keys = iter(jax.random.split(key, 64))
    std = 0.02

    def nrm(shape):
        return jax.random.normal(next(keys), shape, jnp.float32) * std

    params = {
        "word_emb": nrm((VOCAB, HIDDEN)),
        "pos_emb": nrm((MAX_POS, HIDDEN)),
        "type_emb": nrm((2, HIDDEN)),
        "emb_ln_g": jnp.ones((HIDDEN,), jnp.float32),
        "emb_ln_b": jnp.zeros((HIDDEN,), jnp.float32),
        "layers": [],
        "pooler_w": nrm((HIDDEN, HIDDEN)),
        "pooler_b": jnp.zeros((HIDDEN,), jnp.float32),
        "fc_w": nrm((HIDDEN, N_CLASSES)),
        "fc_b": jnp.zeros((N_CLASSES,), jnp.float32),
    }
    for _ in range(LAYERS):
        params["layers"].append({
            "q_w": nrm((HIDDEN, HIDDEN)), "q_b": jnp.zeros((HIDDEN,), jnp.float32),
            "k_w": nrm((HIDDEN, HIDDEN)), "k_b": jnp.zeros((HIDDEN,), jnp.float32),
            "v_w": nrm((HIDDEN, HIDDEN)), "v_b": jnp.zeros((HIDDEN,), jnp.float32),
            "ao_w": nrm((HIDDEN, HIDDEN)), "ao_b": jnp.zeros((HIDDEN,), jnp.float32),
            "ln1_g": jnp.ones((HIDDEN,), jnp.float32), "ln1_b": jnp.zeros((HIDDEN,), jnp.float32),
            "i_w": nrm((HIDDEN, INTERMEDIATE)), "i_b": jnp.zeros((INTERMEDIATE,), jnp.float32),
            "o_w": nrm((INTERMEDIATE, HIDDEN)), "o_b": jnp.zeros((HIDDEN,), jnp.float32),
            "ln2_g": jnp.ones((HIDDEN,), jnp.float32), "ln2_b": jnp.zeros((HIDDEN,), jnp.float32),
        })
    return params


def pack_params(params):
    """Stack per-layer weights, fuse QKV (attention scale folded into Q),
    cast matmul operands to bf16 and lane-pad the classifier head.
    Called ONCE at init time (hoisted out of the jitted forward)."""
    L = params["layers"]
    scale = 1.0 / math.sqrt(HEAD_DIM)

    def fuse_qkv_w(lp):
        return jnp.concatenate([lp["q_w"] * scale, lp["k_w"], lp["v_w"]], axis=1)

    def fuse_qkv_b(lp):
        return jnp.concatenate([lp["q_b"] * scale, lp["k_b"], lp["v_b"]]
                               ).reshape(1, 3 * HIDDEN)

    fc_w = jnp.zeros((HIDDEN, LANE_PAD), jnp.float32).at[:, :N_CLASSES].set(params["fc_w"])
    fc_b = jnp.zeros((1, LANE_PAD), jnp.float32).at[0, :N_CLASSES].set(params["fc_b"])

    return {
        # embedding tables (f32, gathered in plain JAX glue)
        "word_emb": params["word_emb"],
        "pos_emb": params["pos_emb"],
        "type_emb": params["type_emb"],
        # LN / bias params stay f32
        "emb_g": params["emb_ln_g"].reshape(1, HIDDEN),
        "emb_b": params["emb_ln_b"].reshape(1, HIDDEN),
        # fused QKV: (LAYERS, HIDDEN, 3*HIDDEN), bf16 for the MXU
        "qkv_w": jnp.stack([fuse_qkv_w(lp) for lp in L]).astype(jnp.bfloat16),
        "qkv_b": jnp.stack([fuse_qkv_b(lp) for lp in L]),
        "ao_w": jnp.stack([lp["ao_w"] for lp in L]).astype(jnp.bfloat16),
        "ao_b": jnp.stack([lp["ao_b"].reshape(1, HIDDEN) for lp in L]),
        "ln1_g": jnp.stack([lp["ln1_g"].reshape(1, HIDDEN) for lp in L]),
        "ln1_b": jnp.stack([lp["ln1_b"].reshape(1, HIDDEN) for lp in L]),
        "i_w": jnp.stack([lp["i_w"] for lp in L]).astype(jnp.bfloat16),
        "i_b": jnp.stack([lp["i_b"].reshape(1, INTERMEDIATE) for lp in L]),
        "o_w": jnp.stack([lp["o_w"] for lp in L]).astype(jnp.bfloat16),
        "o_b": jnp.stack([lp["o_b"].reshape(1, HIDDEN) for lp in L]),
        "ln2_g": jnp.stack([lp["ln2_g"].reshape(1, HIDDEN) for lp in L]),
        "ln2_b": jnp.stack([lp["ln2_b"].reshape(1, HIDDEN) for lp in L]),
        "pool_w": params["pooler_w"].astype(jnp.bfloat16),
        "pool_b": params["pooler_b"].reshape(1, HIDDEN),
        # classifier head lane-padded to 128 output columns (zero-padded)
        "fc_w": fc_w.astype(jnp.bfloat16),
        "fc_b": fc_b,
    }


# ---------------- forward (ClaimExtractor.forward) ----------------

def claim_extractor_forward(packed, input_ids, attention_mask):
    B, S = input_ids.shape
    BS = B * S
    B_pad = ((B + 7) // 8) * 8

    # BERT embeddings (gather stays as plain-JAX glue)
    # TODO(synk): at BERT-base sizes, gather inside the kernel via scalar prefetch.
    we = jnp.take(packed["word_emb"], input_ids, axis=0)          # (B, S, H)
    pe = packed["pos_emb"][:S][None, :, :]                        # (1, S, H)
    te = packed["type_emb"][0][None, None, :]                     # token_type_ids == 0
    emb = (we + pe + te).reshape(BS, HIDDEN).astype(jnp.float32)

    # one combined additive attention bias: block-diagonal batch separation
    # (-1e9 across batches) + BERT-style key padding (-10000), hoisted out of
    # all layer/head loops
    bidx = jnp.arange(BS, dtype=jnp.int32) // S
    same_batch = bidx[:, None] == bidx[None, :]
    key_mask = attention_mask.astype(jnp.float32).reshape(1, BS)
    attn_bias = jnp.where(same_batch, (1.0 - key_mask) * -10000.0,
                          jnp.float32(-1e9))                       # (B*S, B*S)

    # CLS-row selection matrix: sel[b, b*S] = 1  (padded rows are all-zero)
    rows = jnp.arange(B_pad, dtype=jnp.int32)[:, None]
    cols = jnp.arange(BS, dtype=jnp.int32)[None, :]
    sel = (rows * S == cols).astype(jnp.bfloat16)                  # (B_pad, B*S)

    args = (emb, attn_bias, sel,
            packed["emb_g"], packed["emb_b"],
            packed["qkv_w"], packed["qkv_b"],
            packed["ao_w"], packed["ao_b"],
            packed["ln1_g"], packed["ln1_b"],
            packed["i_w"], packed["i_b"],
            packed["o_w"], packed["o_b"],
            packed["ln2_g"], packed["ln2_b"],
            packed["pool_w"], packed["pool_b"],
            packed["fc_w"], packed["fc_b"])

    vmem_spec = pl.BlockSpec(memory_space=pltpu.MemorySpace.VMEM)  # whole array in VMEM
    out = pl.pallas_call(
        _fused_bert_kernel,
        out_shape=jax.ShapeDtypeStruct((B_pad, LANE_PAD), jnp.float32),
        in_specs=[vmem_spec] * len(args),
        out_specs=vmem_spec,
        compiler_params=pltpu.CompilerParams(vmem_limit_bytes=32 * 1024 * 1024),
    )(*args)

    # drop the sublane padding rows and the lane padding columns
    return out[:B, :N_CLASSES]                                     # (B, 3)


if __name__ == "__main__":
    key = jax.random.PRNGKey(0)
    pkey, ikey = jax.random.split(key)
    params = init_params(pkey)
    packed = pack_params(params)     # packed once, outside the jitted forward

    B, S = 2, 8
    input_ids = jax.random.randint(ikey, (B, S), 0, VOCAB, dtype=jnp.int32)
    attention_mask = jnp.array([[1, 1, 1, 1, 1, 1, 1, 1],
                                [1, 1, 1, 1, 1, 1, 0, 0]], dtype=jnp.int32)

    forward = jax.jit(claim_extractor_forward)
    logits = forward(packed, input_ids, attention_mask)
    logits = jax.block_until_ready(logits)
    assert logits.shape == (B, N_CLASSES)
    assert bool(jnp.all(jnp.isfinite(logits)))
    print("KERNEL_OK")
</pallas_src>

<mosaic_0001>
module attributes {stable_mosaic.version = 11 : i64} {
  func.func @_fused_bert_kernel(%arg0: memref<16x32xf32, #tpu.memory_space<vmem>>, %arg1: memref<16x16xf32, #tpu.memory_space<vmem>>, %arg2: memref<8x16xbf16, #tpu.memory_space<vmem>>, %arg3: memref<1x32xf32, #tpu.memory_space<vmem>>, %arg4: memref<1x32xf32, #tpu.memory_space<vmem>>, %arg5: memref<2x32x96xbf16, #tpu.memory_space<vmem>>, %arg6: memref<2x1x96xf32, #tpu.memory_space<vmem>>, %arg7: memref<2x32x32xbf16, #tpu.memory_space<vmem>>, %arg8: memref<2x1x32xf32, #tpu.memory_space<vmem>>, %arg9: memref<2x1x32xf32, #tpu.memory_space<vmem>>, %arg10: memref<2x1x32xf32, #tpu.memory_space<vmem>>, %arg11: memref<2x32x64xbf16, #tpu.memory_space<vmem>>, %arg12: memref<2x1x64xf32, #tpu.memory_space<vmem>>, %arg13: memref<2x64x32xbf16, #tpu.memory_space<vmem>>, %arg14: memref<2x1x32xf32, #tpu.memory_space<vmem>>, %arg15: memref<2x1x32xf32, #tpu.memory_space<vmem>>, %arg16: memref<2x1x32xf32, #tpu.memory_space<vmem>>, %arg17: memref<32x32xbf16, #tpu.memory_space<vmem>>, %arg18: memref<1x32xf32, #tpu.memory_space<vmem>>, %arg19: memref<32x128xbf16, #tpu.memory_space<vmem>>, %arg20: memref<1x128xf32, #tpu.memory_space<vmem>>, %arg21: memref<8x128xf32, #tpu.memory_space<vmem>>) attributes {dimension_semantics = [], scalar_prefetch = 0 : i64, scratch_operands = 0 : i64, tpu.core_type = #tpu.core_type<tc>} {
    %c0 = arith.constant 0 : index
    %c0_0 = arith.constant 0 : index
    %0 = vector.load %arg0[%c0, %c0_0] : memref<16x32xf32, #tpu.memory_space<vmem>>, vector<16x32xf32>
    %c0_1 = arith.constant 0 : index
    %c0_2 = arith.constant 0 : index
    %1 = vector.load %arg3[%c0_1, %c0_2] : memref<1x32xf32, #tpu.memory_space<vmem>>, vector<1x32xf32>
    %c0_3 = arith.constant 0 : index
    %c0_4 = arith.constant 0 : index
    %2 = vector.load %arg4[%c0_3, %c0_4] : memref<1x32xf32, #tpu.memory_space<vmem>>, vector<1x32xf32>
    %cst = arith.constant dense<0.000000e+00> : vector<16xf32>
    %3 = vector.multi_reduction <add>, %0, %cst [1] : vector<16x32xf32> to vector<16xf32>
    %4 = vector.shape_cast %3 : vector<16xf32> to vector<16x1xf32>
    %cst_5 = arith.constant 3.200000e+01 : f32
    %5 = vector.broadcast %cst_5 : f32 to vector<16x1xf32>
    %6 = arith.divf %4, %5 : vector<16x1xf32>
    %7 = vector.broadcast %6 : vector<16x1xf32> to vector<16x32xf32>
    %8 = arith.subf %0, %7 : vector<16x32xf32>
    %9 = arith.mulf %8, %8 : vector<16x32xf32>
    %cst_6 = arith.constant dense<0.000000e+00> : vector<16xf32>
    %10 = vector.multi_reduction <add>, %9, %cst_6 [1] : vector<16x32xf32> to vector<16xf32>
    %11 = vector.shape_cast %10 : vector<16xf32> to vector<16x1xf32>
    %cst_7 = arith.constant 3.200000e+01 : f32
    %12 = vector.broadcast %cst_7 : f32 to vector<16x1xf32>
    %13 = arith.divf %11, %12 : vector<16x1xf32>
    %cst_8 = arith.constant 9.99999996E-13 : f32
    %14 = vector.broadcast %cst_8 : f32 to vector<16x1xf32>
    %15 = arith.addf %13, %14 : vector<16x1xf32>
    %16 = math.rsqrt %15 : vector<16x1xf32>
    %17 = vector.broadcast %16 : vector<16x1xf32> to vector<16x32xf32>
    %18 = arith.mulf %8, %17 : vector<16x32xf32>
    %19 = vector.broadcast %1 : vector<1x32xf32> to vector<16x32xf32>
    %20 = arith.mulf %18, %19 : vector<16x32xf32>
    %21 = vector.broadcast %2 : vector<1x32xf32> to vector<16x32xf32>
    %22 = arith.addf %20, %21 : vector<16x32xf32>
    %c0_9 = arith.constant 0 : index
    %c0_10 = arith.constant 0 : index
    %23 = vector.load %arg1[%c0_9, %c0_10] : memref<16x16xf32, #tpu.memory_space<vmem>>, vector<16x16xf32>
    %24 = arith.truncf %22 : vector<16x32xf32> to vector<16x32xbf16>
    %c0_11 = arith.constant 0 : index
    %c0_12 = arith.constant 0 : index
    %c0_13 = arith.constant 0 : index
    %25 = vector.load %arg5[%c0_11, %c0_12, %c0_13] : memref<2x32x96xbf16, #tpu.memory_space<vmem>>, vector<1x32x96xbf16>
    %26 = vector.shape_cast %25 : vector<1x32x96xbf16> to vector<32x96xbf16>
    %cst_14 = arith.constant dense<0.000000e+00> : vector<16x96xf32>
    %27 = tpu.matmul %24, %26, %cst_14 {dimension_numbers = #tpu.dot_dimension_numbers<[1], [0], [0], [1], [0, 0, 1, 1], [], []>} : vector<16x32xbf16>, vector<32x96xbf16>, vector<16x96xf32> -> vector<16x96xf32>
    %c0_15 = arith.constant 0 : index
    %c0_16 = arith.constant 0 : index
    %c0_17 = arith.constant 0 : index
    %28 = vector.load %arg6[%c0_15, %c0_16, %c0_17] : memref<2x1x96xf32, #tpu.memory_space<vmem>>, vector<1x1x96xf32>
    %29 = vector.shape_cast %28 : vector<1x1x96xf32> to vector<1x96xf32>
    %30 = vector.broadcast %29 : vector<1x96xf32> to vector<16x96xf32>
    %31 = arith.addf %27, %30 : vector<16x96xf32>
    %c0_18 = arith.constant 0 : index
    %c0_19 = arith.constant 0 : index
    %c0_20 = arith.constant 0 : index
    %32 = vector.load %arg7[%c0_18, %c0_19, %c0_20] : memref<2x32x32xbf16, #tpu.memory_space<vmem>>, vector<1x32x32xbf16>
    %33 = vector.shape_cast %32 : vector<1x32x32xbf16> to vector<32x32xbf16>
    %cst_21 = arith.constant 0.000000e+00 : f32
    %34 = vector.broadcast %cst_21 : f32 to vector<16x32xf32>
    %35 = vector.extract_strided_slice %31 {offsets = [0, 0], sizes = [16, 16], strides = [1, 1]} : vector<16x96xf32> to vector<16x16xf32>
    %36 = vector.extract_strided_slice %31 {offsets = [0, 32], sizes = [16, 16], strides = [1, 1]} : vector<16x96xf32> to vector<16x16xf32>
    %37 = vector.extract_strided_slice %31 {offsets = [0, 64], sizes = [16, 16], strides = [1, 1]} : vector<16x96xf32> to vector<16x16xf32>
    "tpu.trace_start"() <{level = 10 : i32, message = "qd,kd->qk"}> : () -> ()
    %cst_22 = arith.constant dense<0.000000e+00> : vector<16x16xf32>
    %38 = tpu.matmul %35, %36, %cst_22 {dimension_numbers = #tpu.dot_dimension_numbers<[1], [1], [0], [0], [0, 0, 1, 0], [], []>} : vector<16x16xf32>, vector<16x16xf32>, vector<16x16xf32> -> vector<16x16xf32>
    "tpu.trace_stop"() : () -> ()
    %39 = arith.addf %38, %23 : vector<16x16xf32>
    %cst_23 = arith.constant dense<0xFF800000> : vector<16xf32>
    %40 = vector.multi_reduction <maximumf>, %39, %cst_23 [1] : vector<16x16xf32> to vector<16xf32>
    %41 = vector.shape_cast %40 : vector<16xf32> to vector<16x1xf32>
    %42 = vector.broadcast %41 : vector<16x1xf32> to vector<16x16xf32>
    %43 = arith.subf %39, %42 : vector<16x16xf32>
    %44 = math.exp %43 : vector<16x16xf32>
    %cst_24 = arith.constant dense<0.000000e+00> : vector<16xf32>
    %45 = vector.multi_reduction <add>, %44, %cst_24 [1] : vector<16x16xf32> to vector<16xf32>
    %46 = vector.shape_cast %45 : vector<16xf32> to vector<16x1xf32>
    %47 = tpu.reciprocal %46 {approx = true} : vector<16x1xf32> -> vector<16x1xf32>
    %48 = vector.broadcast %47 : vector<16x1xf32> to vector<16x16xf32>
    %49 = arith.mulf %44, %48 : vector<16x16xf32>
    %cst_25 = arith.constant dense<0.000000e+00> : vector<16x16xf32>
    %50 = tpu.matmul %49, %37, %cst_25 {dimension_numbers = #tpu.dot_dimension_numbers<[1], [0], [0], [1], [0, 0, 1, 1], [], []>} : vector<16x16xf32>, vector<16x16xf32>, vector<16x16xf32> -> vector<16x16xf32>
    %51 = arith.truncf %50 : vector<16x16xf32> to vector<16x16xbf16>
    %52 = vector.extract_strided_slice %33 {offsets = [0, 0], sizes = [16, 32], strides = [1, 1]} : vector<32x32xbf16> to vector<16x32xbf16>
    %cst_26 = arith.constant dense<0.000000e+00> : vector<16x32xf32>
    %53 = tpu.matmul %51, %52, %cst_26 {dimension_numbers = #tpu.dot_dimension_numbers<[1], [0], [0], [1], [0, 0, 1, 1], [], []>} : vector<16x16xbf16>, vector<16x32xbf16>, vector<16x32xf32> -> vector<16x32xf32>
    %54 = arith.addf %34, %53 : vector<16x32xf32>
    %55 = vector.extract_strided_slice %31 {offsets = [0, 16], sizes = [16, 16], strides = [1, 1]} : vector<16x96xf32> to vector<16x16xf32>
    %56 = vector.extract_strided_slice %31 {offsets = [0, 48], sizes = [16, 16], strides = [1, 1]} : vector<16x96xf32> to vector<16x16xf32>
    %57 = vector.extract_strided_slice %31 {offsets = [0, 80], sizes = [16, 16], strides = [1, 1]} : vector<16x96xf32> to vector<16x16xf32>
    "tpu.trace_start"() <{level = 10 : i32, message = "qd,kd->qk"}> : () -> ()
    %cst_27 = arith.constant dense<0.000000e+00> : vector<16x16xf32>
    %58 = tpu.matmul %55, %56, %cst_27 {dimension_numbers = #tpu.dot_dimension_numbers<[1], [1], [0], [0], [0, 0, 1, 0], [], []>} : vector<16x16xf32>, vector<16x16xf32>, vector<16x16xf32> -> vector<16x16xf32>
    "tpu.trace_stop"() : () -> ()
    %59 = arith.addf %58, %23 : vector<16x16xf32>
    %cst_28 = arith.constant dense<0xFF800000> : vector<16xf32>
    %60 = vector.multi_reduction <maximumf>, %59, %cst_28 [1] : vector<16x16xf32> to vector<16xf32>
    %61 = vector.shape_cast %60 : vector<16xf32> to vector<16x1xf32>
    %62 = vector.broadcast %61 : vector<16x1xf32> to vector<16x16xf32>
    %63 = arith.subf %59, %62 : vector<16x16xf32>
    %64 = math.exp %63 : vector<16x16xf32>
    %cst_29 = arith.constant dense<0.000000e+00> : vector<16xf32>
    %65 = vector.multi_reduction <add>, %64, %cst_29 [1] : vector<16x16xf32> to vector<16xf32>
    %66 = vector.shape_cast %65 : vector<16xf32> to vector<16x1xf32>
    %67 = tpu.reciprocal %66 {approx = true} : vector<16x1xf32> -> vector<16x1xf32>
    %68 = vector.broadcast %67 : vector<16x1xf32> to vector<16x16xf32>
    %69 = arith.mulf %64, %68 : vector<16x16xf32>
    %cst_30 = arith.constant dense<0.000000e+00> : vector<16x16xf32>
    %70 = tpu.matmul %69, %57, %cst_30 {dimension_numbers = #tpu.dot_dimension_numbers<[1], [0], [0], [1], [0, 0, 1, 1], [], []>} : vector<16x16xf32>, vector<16x16xf32>, vector<16x16xf32> -> vector<16x16xf32>
    %71 = arith.truncf %70 : vector<16x16xf32> to vector<16x16xbf16>
    %72 = vector.extract_strided_slice %33 {offsets = [16, 0], sizes = [16, 32], strides = [1, 1]} : vector<32x32xbf16> to vector<16x32xbf16>
    %cst_31 = arith.constant dense<0.000000e+00> : vector<16x32xf32>
    %73 = tpu.matmul %71, %72, %cst_31 {dimension_numbers = #tpu.dot_dimension_numbers<[1], [0], [0], [1], [0, 0, 1, 1], [], []>} : vector<16x16xbf16>, vector<16x32xbf16>, vector<16x32xf32> -> vector<16x32xf32>
    %74 = arith.addf %54, %73 : vector<16x32xf32>
    %c0_32 = arith.constant 0 : index
    %c0_33 = arith.constant 0 : index
    %c0_34 = arith.constant 0 : index
    %75 = vector.load %arg8[%c0_32, %c0_33, %c0_34] : memref<2x1x32xf32, #tpu.memory_space<vmem>>, vector<1x1x32xf32>
    %76 = vector.shape_cast %75 : vector<1x1x32xf32> to vector<1x32xf32>
    %77 = vector.broadcast %76 : vector<1x32xf32> to vector<16x32xf32>
    %78 = arith.addf %74, %77 : vector<16x32xf32>
    %79 = arith.addf %78, %22 : vector<16x32xf32>
    %c0_35 = arith.constant 0 : index
    %c0_36 = arith.constant 0 : index
    %c0_37 = arith.constant 0 : index
    %80 = vector.load %arg9[%c0_35, %c0_36, %c0_37] : memref<2x1x32xf32, #tpu.memory_space<vmem>>, vector<1x1x32xf32>
    %81 = vector.shape_cast %80 : vector<1x1x32xf32> to vector<1x32xf32>
    %c0_38 = arith.constant 0 : index
    %c0_39 = arith.constant 0 : index
    %c0_40 = arith.constant 0 : index
    %82 = vector.load %arg10[%c0_38, %c0_39, %c0_40] : memref<2x1x32xf32, #tpu.memory_space<vmem>>, vector<1x1x32xf32>
    %83 = vector.shape_cast %82 : vector<1x1x32xf32> to vector<1x32xf32>
    %cst_41 = arith.constant dense<0.000000e+00> : vector<16xf32>
    %84 = vector.multi_reduction <add>, %79, %cst_41 [1] : vector<16x32xf32> to vector<16xf32>
    %85 = vector.shape_cast %84 : vector<16xf32> to vector<16x1xf32>
    %cst_42 = arith.constant 3.200000e+01 : f32
    %86 = vector.broadcast %cst_42 : f32 to vector<16x1xf32>
    %87 = arith.divf %85, %86 : vector<16x1xf32>
    %88 = vector.broadcast %87 : vector<16x1xf32> to vector<16x32xf32>
    %89 = arith.subf %79, %88 : vector<16x32xf32>
    %90 = arith.mulf %89, %89 : vector<16x32xf32>
    %cst_43 = arith.constant dense<0.000000e+00> : vector<16xf32>
    %91 = vector.multi_reduction <add>, %90, %cst_43 [1] : vector<16x32xf32> to vector<16xf32>
    %92 = vector.shape_cast %91 : vector<16xf32> to vector<16x1xf32>
    %cst_44 = arith.constant 3.200000e+01 : f32
    %93 = vector.broadcast %cst_44 : f32 to vector<16x1xf32>
    %94 = arith.divf %92, %93 : vector<16x1xf32>
    %cst_45 = arith.constant 9.99999996E-13 : f32
    %95 = vector.broadcast %cst_45 : f32 to vector<16x1xf32>
    %96 = arith.addf %94, %95 : vector<16x1xf32>
    %97 = math.rsqrt %96 : vector<16x1xf32>
    %98 = vector.broadcast %97 : vector<16x1xf32> to vector<16x32xf32>
    %99 = arith.mulf %89, %98 : vector<16x32xf32>
    %100 = vector.broadcast %81 : vector<1x32xf32> to vector<16x32xf32>
    %101 = arith.mulf %99, %100 : vector<16x32xf32>
    %102 = vector.broadcast %83 : vector<1x32xf32> to vector<16x32xf32>
    %103 = arith.addf %101, %102 : vector<16x32xf32>
    %104 = arith.truncf %103 : vector<16x32xf32> to vector<16x32xbf16>
    %c0_46 = arith.constant 0 : index
    %c0_47 = arith.constant 0 : index
    %c0_48 = arith.constant 0 : index
    %105 = vector.load %arg11[%c0_46, %c0_47, %c0_48] : memref<2x32x64xbf16, #tpu.memory_space<vmem>>, vector<1x32x64xbf16>
    %106 = vector.shape_cast %105 : vector<1x32x64xbf16> to vector<32x64xbf16>
    %cst_49 = arith.constant dense<0.000000e+00> : vector<16x64xf32>
    %107 = tpu.matmul %104, %106, %cst_49 {dimension_numbers = #tpu.dot_dimension_numbers<[1], [0], [0], [1], [0, 0, 1, 1], [], []>} : vector<16x32xbf16>, vector<32x64xbf16>, vector<16x64xf32> -> vector<16x64xf32>
    %c0_50 = arith.constant 0 : index
    %c0_51 = arith.constant 0 : index
    %c0_52 = arith.constant 0 : index
    %108 = vector.load %arg12[%c0_50, %c0_51, %c0_52] : memref<2x1x64xf32, #tpu.memory_space<vmem>>, vector<1x1x64xf32>
    %109 = vector.shape_cast %108 : vector<1x1x64xf32> to vector<1x64xf32>
    %110 = vector.broadcast %109 : vector<1x64xf32> to vector<16x64xf32>
    %111 = arith.addf %107, %110 : vector<16x64xf32>
    %cst_53 = arith.constant 5.000000e-01 : f32
    %112 = vector.broadcast %cst_53 : f32 to vector<16x64xf32>
    %113 = arith.mulf %112, %111 : vector<16x64xf32>
    %cst_54 = arith.constant 4.471500e-02 : f32
    %114 = vector.broadcast %cst_54 : f32 to vector<16x64xf32>
    %115 = arith.mulf %114, %111 : vector<16x64xf32>
    %116 = arith.mulf %115, %111 : vector<16x64xf32>
    %117 = arith.mulf %116, %111 : vector<16x64xf32>
    %118 = arith.addf %111, %117 : vector<16x64xf32>
    %cst_55 = arith.constant 0.797884583 : f32
    %119 = vector.broadcast %cst_55 : f32 to vector<16x64xf32>
    %120 = arith.mulf %119, %118 : vector<16x64xf32>
    %121 = math.tanh %120 : vector<16x64xf32>
    %cst_56 = arith.constant 1.000000e+00 : f32
    %122 = vector.broadcast %cst_56 : f32 to vector<16x64xf32>
    %123 = arith.addf %122, %121 : vector<16x64xf32>
    %124 = arith.mulf %113, %123 : vector<16x64xf32>
    %125 = arith.truncf %124 : vector<16x64xf32> to vector<16x64xbf16>
    %c0_57 = arith.constant 0 : index
    %c0_58 = arith.constant 0 : index
    %c0_59 = arith.constant 0 : index
    %126 = vector.load %arg13[%c0_57, %c0_58, %c0_59] : memref<2x64x32xbf16, #tpu.memory_space<vmem>>, vector<1x64x32xbf16>
    %127 = vector.shape_cast %126 : vector<1x64x32xbf16> to vector<64x32xbf16>
    %cst_60 = arith.constant dense<0.000000e+00> : vector<16x32xf32>
    %128 = tpu.matmul %125, %127, %cst_60 {dimension_numbers = #tpu.dot_dimension_numbers<[1], [0], [0], [1], [0, 0, 1, 1], [], []>} : vector<16x64xbf16>, vector<64x32xbf16>, vector<16x32xf32> -> vector<16x32xf32>
    %c0_61 = arith.constant 0 : index
    %c0_62 = arith.constant 0 : index
    %c0_63 = arith.constant 0 : index
    %129 = vector.load %arg14[%c0_61, %c0_62, %c0_63] : memref<2x1x32xf32, #tpu.memory_space<vmem>>, vector<1x1x32xf32>
    %130 = vector.shape_cast %129 : vector<1x1x32xf32> to vector<1x32xf32>
    %131 = vector.broadcast %130 : vector<1x32xf32> to vector<16x32xf32>
    %132 = arith.addf %128, %131 : vector<16x32xf32>
    %133 = arith.addf %132, %103 : vector<16x32xf32>
    %c0_64 = arith.constant 0 : index
    %c0_65 = arith.constant 0 : index
    %c0_66 = arith.constant 0 : index
    %134 = vector.load %arg15[%c0_64, %c0_65, %c0_66] : memref<2x1x32xf32, #tpu.memory_space<vmem>>, vector<1x1x32xf32>
    %135 = vector.shape_cast %134 : vector<1x1x32xf32> to vector<1x32xf32>
    %c0_67 = arith.constant 0 : index
    %c0_68 = arith.constant 0 : index
    %c0_69 = arith.constant 0 : index
    %136 = vector.load %arg16[%c0_67, %c0_68, %c0_69] : memref<2x1x32xf32, #tpu.memory_space<vmem>>, vector<1x1x32xf32>
    %137 = vector.shape_cast %136 : vector<1x1x32xf32> to vector<1x32xf32>
    %cst_70 = arith.constant dense<0.000000e+00> : vector<16xf32>
    %138 = vector.multi_reduction <add>, %133, %cst_70 [1] : vector<16x32xf32> to vector<16xf32>
    %139 = vector.shape_cast %138 : vector<16xf32> to vector<16x1xf32>
    %cst_71 = arith.constant 3.200000e+01 : f32
    %140 = vector.broadcast %cst_71 : f32 to vector<16x1xf32>
    %141 = arith.divf %139, %140 : vector<16x1xf32>
    %142 = vector.broadcast %141 : vector<16x1xf32> to vector<16x32xf32>
    %143 = arith.subf %133, %142 : vector<16x32xf32>
    %144 = arith.mulf %143, %143 : vector<16x32xf32>
    %cst_72 = arith.constant dense<0.000000e+00> : vector<16xf32>
    %145 = vector.multi_reduction <add>, %144, %cst_72 [1] : vector<16x32xf32> to vector<16xf32>
    %146 = vector.shape_cast %145 : vector<16xf32> to vector<16x1xf32>
    %cst_73 = arith.constant 3.200000e+01 : f32
    %147 = vector.broadcast %cst_73 : f32 to vector<16x1xf32>
    %148 = arith.divf %146, %147 : vector<16x1xf32>
    %cst_74 = arith.constant 9.99999996E-13 : f32
    %149 = vector.broadcast %cst_74 : f32 to vector<16x1xf32>
    %150 = arith.addf %148, %149 : vector<16x1xf32>
    %151 = math.rsqrt %150 : vector<16x1xf32>
    %152 = vector.broadcast %151 : vector<16x1xf32> to vector<16x32xf32>
    %153 = arith.mulf %143, %152 : vector<16x32xf32>
    %154 = vector.broadcast %135 : vector<1x32xf32> to vector<16x32xf32>
    %155 = arith.mulf %153, %154 : vector<16x32xf32>
    %156 = vector.broadcast %137 : vector<1x32xf32> to vector<16x32xf32>
    %157 = arith.addf %155, %156 : vector<16x32xf32>
    %158 = arith.truncf %157 : vector<16x32xf32> to vector<16x32xbf16>
    %c1 = arith.constant 1 : index
    %c0_75 = arith.constant 0 : index
    %c0_76 = arith.constant 0 : index
    %159 = vector.load %arg5[%c1, %c0_75, %c0_76] : memref<2x32x96xbf16, #tpu.memory_space<vmem>>, vector<1x32x96xbf16>
    %160 = vector.shape_cast %159 : vector<1x32x96xbf16> to vector<32x96xbf16>
    %cst_77 = arith.constant dense<0.000000e+00> : vector<16x96xf32>
    %161 = tpu.matmul %158, %160, %cst_77 {dimension_numbers = #tpu.dot_dimension_numbers<[1], [0], [0], [1], [0, 0, 1, 1], [], []>} : vector<16x32xbf16>, vector<32x96xbf16>, vector<16x96xf32> -> vector<16x96xf32>
    %c1_78 = arith.constant 1 : index
    %c0_79 = arith.constant 0 : index
    %c0_80 = arith.constant 0 : index
    %162 = vector.load %arg6[%c1_78, %c0_79, %c0_80] : memref<2x1x96xf32, #tpu.memory_space<vmem>>, vector<1x1x96xf32>
    %163 = vector.shape_cast %162 : vector<1x1x96xf32> to vector<1x96xf32>
    %164 = vector.broadcast %163 : vector<1x96xf32> to vector<16x96xf32>
    %165 = arith.addf %161, %164 : vector<16x96xf32>
    %c1_81 = arith.constant 1 : index
    %c0_82 = arith.constant 0 : index
    %c0_83 = arith.constant 0 : index
    %166 = vector.load %arg7[%c1_81, %c0_82, %c0_83] : memref<2x32x32xbf16, #tpu.memory_space<vmem>>, vector<1x32x32xbf16>
    %167 = vector.shape_cast %166 : vector<1x32x32xbf16> to vector<32x32xbf16>
    %cst_84 = arith.constant 0.000000e+00 : f32
    %168 = vector.broadcast %cst_84 : f32 to vector<16x32xf32>
    %169 = vector.extract_strided_slice %165 {offsets = [0, 0], sizes = [16, 16], strides = [1, 1]} : vector<16x96xf32> to vector<16x16xf32>
    %170 = vector.extract_strided_slice %165 {offsets = [0, 32], sizes = [16, 16], strides = [1, 1]} : vector<16x96xf32> to vector<16x16xf32>
    %171 = vector.extract_strided_slice %165 {offsets = [0, 64], sizes = [16, 16], strides = [1, 1]} : vector<16x96xf32> to vector<16x16xf32>
    "tpu.trace_start"() <{level = 10 : i32, message = "qd,kd->qk"}> : () -> ()
    %cst_85 = arith.constant dense<0.000000e+00> : vector<16x16xf32>
    %172 = tpu.matmul %169, %170, %cst_85 {dimension_numbers = #tpu.dot_dimension_numbers<[1], [1], [0], [0], [0, 0, 1, 0], [], []>} : vector<16x16xf32>, vector<16x16xf32>, vector<16x16xf32> -> vector<16x16xf32>
    "tpu.trace_stop"() : () -> ()
    %173 = arith.addf %172, %23 : vector<16x16xf32>
    %cst_86 = arith.constant dense<0xFF800000> : vector<16xf32>
    %174 = vector.multi_reduction <maximumf>, %173, %cst_86 [1] : vector<16x16xf32> to vector<16xf32>
    %175 = vector.shape_cast %174 : vector<16xf32> to vector<16x1xf32>
    %176 = vector.broadcast %175 : vector<16x1xf32> to vector<16x16xf32>
    %177 = arith.subf %173, %176 : vector<16x16xf32>
    %178 = math.exp %177 : vector<16x16xf32>
    %cst_87 = arith.constant dense<0.000000e+00> : vector<16xf32>
    %179 = vector.multi_reduction <add>, %178, %cst_87 [1] : vector<16x16xf32> to vector<16xf32>
    %180 = vector.shape_cast %179 : vector<16xf32> to vector<16x1xf32>
    %181 = tpu.reciprocal %180 {approx = true} : vector<16x1xf32> -> vector<16x1xf32>
    %182 = vector.broadcast %181 : vector<16x1xf32> to vector<16x16xf32>
    %183 = arith.mulf %178, %182 : vector<16x16xf32>
    %cst_88 = arith.constant dense<0.000000e+00> : vector<16x16xf32>
    %184 = tpu.matmul %183, %171, %cst_88 {dimension_numbers = #tpu.dot_dimension_numbers<[1], [0], [0], [1], [0, 0, 1, 1], [], []>} : vector<16x16xf32>, vector<16x16xf32>, vector<16x16xf32> -> vector<16x16xf32>
    %185 = arith.truncf %184 : vector<16x16xf32> to vector<16x16xbf16>
    %186 = vector.extract_strided_slice %167 {offsets = [0, 0], sizes = [16, 32], strides = [1, 1]} : vector<32x32xbf16> to vector<16x32xbf16>
    %cst_89 = arith.constant dense<0.000000e+00> : vector<16x32xf32>
    %187 = tpu.matmul %185, %186, %cst_89 {dimension_numbers = #tpu.dot_dimension_numbers<[1], [0], [0], [1], [0, 0, 1, 1], [], []>} : vector<16x16xbf16>, vector<16x32xbf16>, vector<16x32xf32> -> vector<16x32xf32>
    %188 = arith.addf %168, %187 : vector<16x32xf32>
    %189 = vector.extract_strided_slice %165 {offsets = [0, 16], sizes = [16, 16], strides = [1, 1]} : vector<16x96xf32> to vector<16x16xf32>
    %190 = vector.extract_strided_slice %165 {offsets = [0, 48], sizes = [16, 16], strides = [1, 1]} : vector<16x96xf32> to vector<16x16xf32>
    %191 = vector.extract_strided_slice %165 {offsets = [0, 80], sizes = [16, 16], strides = [1, 1]} : vector<16x96xf32> to vector<16x16xf32>
    "tpu.trace_start"() <{level = 10 : i32, message = "qd,kd->qk"}> : () -> ()
    %cst_90 = arith.constant dense<0.000000e+00> : vector<16x16xf32>
    %192 = tpu.matmul %189, %190, %cst_90 {dimension_numbers = #tpu.dot_dimension_numbers<[1], [1], [0], [0], [0, 0, 1, 0], [], []>} : vector<16x16xf32>, vector<16x16xf32>, vector<16x16xf32> -> vector<16x16xf32>
    "tpu.trace_stop"() : () -> ()
    %193 = arith.addf %192, %23 : vector<16x16xf32>
    %cst_91 = arith.constant dense<0xFF800000> : vector<16xf32>
    %194 = vector.multi_reduction <maximumf>, %193, %cst_91 [1] : vector<16x16xf32> to vector<16xf32>
    %195 = vector.shape_cast %194 : vector<16xf32> to vector<16x1xf32>
    %196 = vector.broadcast %195 : vector<16x1xf32> to vector<16x16xf32>
    %197 = arith.subf %193, %196 : vector<16x16xf32>
    %198 = math.exp %197 : vector<16x16xf32>
    %cst_92 = arith.constant dense<0.000000e+00> : vector<16xf32>
    %199 = vector.multi_reduction <add>, %198, %cst_92 [1] : vector<16x16xf32> to vector<16xf32>
    %200 = vector.shape_cast %199 : vector<16xf32> to vector<16x1xf32>
    %201 = tpu.reciprocal %200 {approx = true} : vector<16x1xf32> -> vector<16x1xf32>
    %202 = vector.broadcast %201 : vector<16x1xf32> to vector<16x16xf32>
    %203 = arith.mulf %198, %202 : vector<16x16xf32>
    %cst_93 = arith.constant dense<0.000000e+00> : vector<16x16xf32>
    %204 = tpu.matmul %203, %191, %cst_93 {dimension_numbers = #tpu.dot_dimension_numbers<[1], [0], [0], [1], [0, 0, 1, 1], [], []>} : vector<16x16xf32>, vector<16x16xf32>, vector<16x16xf32> -> vector<16x16xf32>
    %205 = arith.truncf %204 : vector<16x16xf32> to vector<16x16xbf16>
    %206 = vector.extract_strided_slice %167 {offsets = [16, 0], sizes = [16, 32], strides = [1, 1]} : vector<32x32xbf16> to vector<16x32xbf16>
    %cst_94 = arith.constant dense<0.000000e+00> : vector<16x32xf32>
    %207 = tpu.matmul %205, %206, %cst_94 {dimension_numbers = #tpu.dot_dimension_numbers<[1], [0], [0], [1], [0, 0, 1, 1], [], []>} : vector<16x16xbf16>, vector<16x32xbf16>, vector<16x32xf32> -> vector<16x32xf32>
    %208 = arith.addf %188, %207 : vector<16x32xf32>
    %c1_95 = arith.constant 1 : index
    %c0_96 = arith.constant 0 : index
    %c0_97 = arith.constant 0 : index
    %209 = vector.load %arg8[%c1_95, %c0_96, %c0_97] : memref<2x1x32xf32, #tpu.memory_space<vmem>>, vector<1x1x32xf32>
    %210 = vector.shape_cast %209 : vector<1x1x32xf32> to vector<1x32xf32>
    %211 = vector.broadcast %210 : vector<1x32xf32> to vector<16x32xf32>
    %212 = arith.addf %208, %211 : vector<16x32xf32>
    %213 = arith.addf %212, %157 : vector<16x32xf32>
    %c1_98 = arith.constant 1 : index
    %c0_99 = arith.constant 0 : index
    %c0_100 = arith.constant 0 : index
    %214 = vector.load %arg9[%c1_98, %c0_99, %c0_100] : memref<2x1x32xf32, #tpu.memory_space<vmem>>, vector<1x1x32xf32>
    %215 = vector.shape_cast %214 : vector<1x1x32xf32> to vector<1x32xf32>
    %c1_101 = arith.constant 1 : index
    %c0_102 = arith.constant 0 : index
    %c0_103 = arith.constant 0 : index
    %216 = vector.load %arg10[%c1_101, %c0_102, %c0_103] : memref<2x1x32xf32, #tpu.memory_space<vmem>>, vector<1x1x32xf32>
    %217 = vector.shape_cast %216 : vector<1x1x32xf32> to vector<1x32xf32>
    %cst_104 = arith.constant dense<0.000000e+00> : vector<16xf32>
    %218 = vector.multi_reduction <add>, %213, %cst_104 [1] : vector<16x32xf32> to vector<16xf32>
    %219 = vector.shape_cast %218 : vector<16xf32> to vector<16x1xf32>
    %cst_105 = arith.constant 3.200000e+01 : f32
    %220 = vector.broadcast %cst_105 : f32 to vector<16x1xf32>
    %221 = arith.divf %219, %220 : vector<16x1xf32>
    %222 = vector.broadcast %221 : vector<16x1xf32> to vector<16x32xf32>
    %223 = arith.subf %213, %222 : vector<16x32xf32>
    %224 = arith.mulf %223, %223 : vector<16x32xf32>
    %cst_106 = arith.constant dense<0.000000e+00> : vector<16xf32>
    %225 = vector.multi_reduction <add>, %224, %cst_106 [1] : vector<16x32xf32> to vector<16xf32>
    %226 = vector.shape_cast %225 : vector<16xf32> to vector<16x1xf32>
    %cst_107 = arith.constant 3.200000e+01 : f32
    %227 = vector.broadcast %cst_107 : f32 to vector<16x1xf32>
    %228 = arith.divf %226, %227 : vector<16x1xf32>
    %cst_108 = arith.constant 9.99999996E-13 : f32
    %229 = vector.broadcast %cst_108 : f32 to vector<16x1xf32>
    %230 = arith.addf %228, %229 : vector<16x1xf32>
    %231 = math.rsqrt %230 : vector<16x1xf32>
    %232 = vector.broadcast %231 : vector<16x1xf32> to vector<16x32xf32>
    %233 = arith.mulf %223, %232 : vector<16x32xf32>
    %234 = vector.broadcast %215 : vector<1x32xf32> to vector<16x32xf32>
    %235 = arith.mulf %233, %234 : vector<16x32xf32>
    %236 = vector.broadcast %217 : vector<1x32xf32> to vector<16x32xf32>
    %237 = arith.addf %235, %236 : vector<16x32xf32>
    %238 = arith.truncf %237 : vector<16x32xf32> to vector<16x32xbf16>
    %c1_109 = arith.constant 1 : index
    %c0_110 = arith.constant 0 : index
    %c0_111 = arith.constant 0 : index
    %239 = vector.load %arg11[%c1_109, %c0_110, %c0_111] : memref<2x32x64xbf16, #tpu.memory_space<vmem>>, vector<1x32x64xbf16>
    %240 = vector.shape_cast %239 : vector<1x32x64xbf16> to vector<32x64xbf16>
    %cst_112 = arith.constant dense<0.000000e+00> : vector<16x64xf32>
    %241 = tpu.matmul %238, %240, %cst_112 {dimension_numbers = #tpu.dot_dimension_numbers<[1], [0], [0], [1], [0, 0, 1, 1], [], []>} : vector<16x32xbf16>, vector<32x64xbf16>, vector<16x64xf32> -> vector<16x64xf32>
    %c1_113 = arith.constant 1 : index
    %c0_114 = arith.constant 0 : index
    %c0_115 = arith.constant 0 : index
    %242 = vector.load %arg12[%c1_113, %c0_114, %c0_115] : memref<2x1x64xf32, #tpu.memory_space<vmem>>, vector<1x1x64xf32>
    %243 = vector.shape_cast %242 : vector<1x1x64xf32> to vector<1x64xf32>
    %244 = vector.broadcast %243 : vector<1x64xf32> to vector<16x64xf32>
    %245 = arith.addf %241, %244 : vector<16x64xf32>
    %cst_116 = arith.constant 5.000000e-01 : f32
    %246 = vector.broadcast %cst_116 : f32 to vector<16x64xf32>
    %247 = arith.mulf %246, %245 : vector<16x64xf32>
    %cst_117 = arith.constant 4.471500e-02 : f32
    %248 = vector.broadcast %cst_117 : f32 to vector<16x64xf32>
    %249 = arith.mulf %248, %245 : vector<16x64xf32>
    %250 = arith.mulf %249, %245 : vector<16x64xf32>
    %251 = arith.mulf %250, %245 : vector<16x64xf32>
    %252 = arith.addf %245, %251 : vector<16x64xf32>
    %cst_118 = arith.constant 0.797884583 : f32
    %253 = vector.broadcast %cst_118 : f32 to vector<16x64xf32>
    %254 = arith.mulf %253, %252 : vector<16x64xf32>
    %255 = math.tanh %254 : vector<16x64xf32>
    %cst_119 = arith.constant 1.000000e+00 : f32
    %256 = vector.broadcast %cst_119 : f32 to vector<16x64xf32>
    %257 = arith.addf %256, %255 : vector<16x64xf32>
    %258 = arith.mulf %247, %257 : vector<16x64xf32>
    %259 = arith.truncf %258 : vector<16x64xf32> to vector<16x64xbf16>
    %c1_120 = arith.constant 1 : index
    %c0_121 = arith.constant 0 : index
    %c0_122 = arith.constant 0 : index
    %260 = vector.load %arg13[%c1_120, %c0_121, %c0_122] : memref<2x64x32xbf16, #tpu.memory_space<vmem>>, vector<1x64x32xbf16>
    %261 = vector.shape_cast %260 : vector<1x64x32xbf16> to vector<64x32xbf16>
    %cst_123 = arith.constant dense<0.000000e+00> : vector<16x32xf32>
    %262 = tpu.matmul %259, %261, %cst_123 {dimension_numbers = #tpu.dot_dimension_numbers<[1], [0], [0], [1], [0, 0, 1, 1], [], []>} : vector<16x64xbf16>, vector<64x32xbf16>, vector<16x32xf32> -> vector<16x32xf32>
    %c1_124 = arith.constant 1 : index
    %c0_125 = arith.constant 0 : index
    %c0_126 = arith.constant 0 : index
    %263 = vector.load %arg14[%c1_124, %c0_125, %c0_126] : memref<2x1x32xf32, #tpu.memory_space<vmem>>, vector<1x1x32xf32>
    %264 = vector.shape_cast %263 : vector<1x1x32xf32> to vector<1x32xf32>
    %265 = vector.broadcast %264 : vector<1x32xf32> to vector<16x32xf32>
    %266 = arith.addf %262, %265 : vector<16x32xf32>
    %267 = arith.addf %266, %237 : vector<16x32xf32>
    %c1_127 = arith.constant 1 : index
    %c0_128 = arith.constant 0 : index
    %c0_129 = arith.constant 0 : index
    %268 = vector.load %arg15[%c1_127, %c0_128, %c0_129] : memref<2x1x32xf32, #tpu.memory_space<vmem>>, vector<1x1x32xf32>
    %269 = vector.shape_cast %268 : vector<1x1x32xf32> to vector<1x32xf32>
    %c1_130 = arith.constant 1 : index
    %c0_131 = arith.constant 0 : index
    %c0_132 = arith.constant 0 : index
    %270 = vector.load %arg16[%c1_130, %c0_131, %c0_132] : memref<2x1x32xf32, #tpu.memory_space<vmem>>, vector<1x1x32xf32>
    %271 = vector.shape_cast %270 : vector<1x1x32xf32> to vector<1x32xf32>
    %cst_133 = arith.constant dense<0.000000e+00> : vector<16xf32>
    %272 = vector.multi_reduction <add>, %267, %cst_133 [1] : vector<16x32xf32> to vector<16xf32>
    %273 = vector.shape_cast %272 : vector<16xf32> to vector<16x1xf32>
    %cst_134 = arith.constant 3.200000e+01 : f32
    %274 = vector.broadcast %cst_134 : f32 to vector<16x1xf32>
    %275 = arith.divf %273, %274 : vector<16x1xf32>
    %276 = vector.broadcast %275 : vector<16x1xf32> to vector<16x32xf32>
    %277 = arith.subf %267, %276 : vector<16x32xf32>
    %278 = arith.mulf %277, %277 : vector<16x32xf32>
    %cst_135 = arith.constant dense<0.000000e+00> : vector<16xf32>
    %279 = vector.multi_reduction <add>, %278, %cst_135 [1] : vector<16x32xf32> to vector<16xf32>
    %280 = vector.shape_cast %279 : vector<16xf32> to vector<16x1xf32>
    %cst_136 = arith.constant 3.200000e+01 : f32
    %281 = vector.broadcast %cst_136 : f32 to vector<16x1xf32>
    %282 = arith.divf %280, %281 : vector<16x1xf32>
    %cst_137 = arith.constant 9.99999996E-13 : f32
    %283 = vector.broadcast %cst_137 : f32 to vector<16x1xf32>
    %284 = arith.addf %282, %283 : vector<16x1xf32>
    %285 = math.rsqrt %284 : vector<16x1xf32>
    %286 = vector.broadcast %285 : vector<16x1xf32> to vector<16x32xf32>
    %287 = arith.mulf %277, %286 : vector<16x32xf32>
    %288 = vector.broadcast %269 : vector<1x32xf32> to vector<16x32xf32>
    %289 = arith.mulf %287, %288 : vector<16x32xf32>
    %290 = vector.broadcast %271 : vector<1x32xf32> to vector<16x32xf32>
    %291 = arith.addf %289, %290 : vector<16x32xf32>
    %c0_138 = arith.constant 0 : index
    %c0_139 = arith.constant 0 : index
    %292 = vector.load %arg2[%c0_138, %c0_139] : memref<8x16xbf16, #tpu.memory_space<vmem>>, vector<8x16xbf16>
    %293 = arith.truncf %291 : vector<16x32xf32> to vector<16x32xbf16>
    %cst_140 = arith.constant dense<0.000000e+00> : vector<8x32xf32>
    %294 = tpu.matmul %292, %293, %cst_140 {dimension_numbers = #tpu.dot_dimension_numbers<[1], [0], [0], [1], [0, 0, 1, 1], [], []>} : vector<8x16xbf16>, vector<16x32xbf16>, vector<8x32xf32> -> vector<8x32xf32>
    %295 = arith.truncf %294 : vector<8x32xf32> to vector<8x32xbf16>
    %c0_141 = arith.constant 0 : index
    %c0_142 = arith.constant 0 : index
    %296 = vector.load %arg17[%c0_141, %c0_142] : memref<32x32xbf16, #tpu.memory_space<vmem>>, vector<32x32xbf16>
    %cst_143 = arith.constant dense<0.000000e+00> : vector<8x32xf32>
    %297 = tpu.matmul %295, %296, %cst_143 {dimension_numbers = #tpu.dot_dimension_numbers<[1], [0], [0], [1], [0, 0, 1, 1], [], []>} : vector<8x32xbf16>, vector<32x32xbf16>, vector<8x32xf32> -> vector<8x32xf32>
    %c0_144 = arith.constant 0 : index
    %c0_145 = arith.constant 0 : index
    %298 = vector.load %arg18[%c0_144, %c0_145] : memref<1x32xf32, #tpu.memory_space<vmem>>, vector<1x32xf32>
    %299 = vector.broadcast %298 : vector<1x32xf32> to vector<8x32xf32>
    %300 = arith.addf %297, %299 : vector<8x32xf32>
    %301 = math.tanh %300 : vector<8x32xf32>
    %302 = arith.truncf %301 : vector<8x32xf32> to vector<8x32xbf16>
    %c0_146 = arith.constant 0 : index
    %c0_147 = arith.constant 0 : index
    %303 = vector.load %arg19[%c0_146, %c0_147] : memref<32x128xbf16, #tpu.memory_space<vmem>>, vector<32x128xbf16>
    %cst_148 = arith.constant dense<0.000000e+00> : vector<8x128xf32>
    %304 = tpu.matmul %302, %303, %cst_148 {dimension_numbers = #tpu.dot_dimension_numbers<[1], [0], [0], [1], [0, 0, 1, 1], [], []>} : vector<8x32xbf16>, vector<32x128xbf16>, vector<8x128xf32> -> vector<8x128xf32>
    %c0_149 = arith.constant 0 : index
    %c0_150 = arith.constant 0 : index
    %305 = vector.load %arg20[%c0_149, %c0_150] : memref<1x128xf32, #tpu.memory_space<vmem>>, vector<1x128xf32>
    %306 = vector.broadcast %305 : vector<1x128xf32> to vector<8x128xf32>
    %307 = arith.addf %304, %306 : vector<8x128xf32>
    %c0_151 = arith.constant 0 : index
    %c0_152 = arith.constant 0 : index
    %308 = vector.load %arg21[%c0_151, %c0_152] : memref<8x128xf32, #tpu.memory_space<vmem>>, vector<8x128xf32>
    tpu.vector_store %arg21[%c0_151, %c0_152], %307 {strides = array<i32>} : memref<8x128xf32, #tpu.memory_space<vmem>>, vector<8x128xf32>,
    return
  }
}

</mosaic_0001>

<bundles_post_ra>
// kernel: claim_extractor_forward.1
= control target key start
LH: loop header
LB: loop body
LE: loop exit
PB: predicated region body
PF: predicated region fallthrough
CT: control target
= control target key end

     0   :  { %vm73_vm0 = vcmask 261120   ;;  %v2434_v14 = vmov 0.0   ;;  %vm2435_vm1 = vmmov 0   ;;  %vm197_vm2 = vcmask 130048   ;;  %s2437_s28 = smov 80   ;;  %s2438_s29 = smov 112   ;;  %s2913_s0 = inlined_call_operand.vmem [shape: f32[16,32], index: 0, kind: input, shape index: {}]   ;;  %s2914_s5 = inlined_call_operand.vmem [shape: bf16[2,32,96], index: 5, kind: input, shape index: {}]   ;;  %s2915_s3 = inlined_call_operand.vmem [shape: f32[1,32], index: 3, kind: input, shape index: {}]   ;;  %s2916_s4 = inlined_call_operand.vmem [shape: f32[1,32], index: 4, kind: input, shape index: {}]   ;;  %s2917_s6 = inlined_call_operand.vmem [shape: f32[2,1,96], index: 6, kind: input, shape index: {}]   ;;  %s2918_s1 = inlined_call_operand.vmem [shape: f32[16,16], index: 1, kind: input, shape index: {}]   ;;  %s2919_s7 = inlined_call_operand.vmem [shape: bf16[2,32,32], index: 7, kind: input, shape index: {}]   ;;  %s2920_s8 = inlined_call_operand.vmem [shape: f32[2,1,32], index: 8, kind: input, shape index: {}]   ;;  %s2921_s11 = inlined_call_operand.vmem [shape: bf16[2,32,64], index: 11, kind: input, shape index: {}]   ;;  %s2922_s9 = inlined_call_operand.vmem [shape: f32[2,1,32], index: 9, kind: input, shape index: {}]   ;;  %s2923_s10 = inlined_call_operand.vmem [shape: f32[2,1,32], index: 10, kind: input, shape index: {}]   ;;  %s2924_s13 = inlined_call_operand.vmem [shape: bf16[2,64,32], index: 13, kind: input, shape index: {}]   ;;  %s2925_s12 = inlined_call_operand.vmem [shape: f32[2,1,64], index: 12, kind: input, shape index: {}]   ;;  %s2926_s14 = inlined_call_operand.vmem [shape: f32[2,1,32], index: 14, kind: input, shape index: {}]   ;;  %s2927_s15 = inlined_call_operand.vmem [shape: f32[2,1,32], index: 15, kind: input, shape index: {}]   ;;  %s2928_s16 = inlined_call_operand.vmem [shape: f32[2,1,32], index: 16, kind: input, shape index: {}]   ;;  %s2929_s17 = inlined_call_operand.vmem [shape: bf16[32,32], index: 17, kind: input, shape index: {}]   ;;  %s2930_s2 = inlined_call_operand.vmem [shape: bf16[8,16], index: 2, kind: input, shape index: {}]   ;;  %s2931_s19 = inlined_call_operand.vmem [shape: bf16[32,128], index: 19, kind: input, shape index: {}]   ;;  %s2932_s18 = inlined_call_operand.vmem [shape: f32[1,32], index: 18, kind: input, shape index: {}]   ;;  %s2933_s20 = inlined_call_operand.vmem [shape: f32[1,128], index: 20, kind: input, shape index: {}]   ;;  %s2934_s21 = inlined_call_operand.vmem [shape: f32[8,128], index: 21, kind: output, shape index: {}]  }
   0x1   :  { %2939 = sst [smem:[#allocation2_spill]] %s2913_s0  ;;  %2183 = vmatprep.subr.bf16.mxu0 %v2434_v14  ;;  %2187 = vmatprep.mubr.msk.bf16.mxu0 %vm2435_vm1, %v2434_v14  ;;  %s2440_s24 = smov 48   ;;  %vm873_vm3 = vcmask 523264  }
   0x2   :  { %2940 = sst [smem:[#allocation3_spill]] %s2914_s5  ;;  %s2439_s5 = smov 64  }
   0x3   :  { %2941 = sst [smem:[#allocation4_spill]] %s2915_s3 }
   0x4   :  { %2942 = sst [smem:[#allocation5_spill]] %s2916_s4  ;;  %s2436_s4 = smov 96  }
   0x5   :  { %2943 = sst [smem:[#allocation6_spill]] %s2917_s6 }
   0x6   :  { %2944 = sst [smem:[#allocation7_spill]] %s2918_s1 }
   0x7   :  { %s2945_s26 = sld [smem:[#allocation2_spill]] }
   0x8   :  { %s2946_s0 = sld [smem:[#allocation3_spill]] }
   0x9   :  { %s2947_s23 = sld [smem:[#allocation4_spill]] }
   0xa   :  { %s2948_s3 = sld [smem:[#allocation5_spill]] }
   0xb   :  { %s2949_s27 = sld [smem:[#allocation6_spill]] }
   0xc   :  { %s2950_s1 = sld [smem:[#allocation7_spill]] }
   0xd   :  { %v69_v0 = vld [vmem:[%s2945_s26] sm:$0xff]  ;;  %v70_v1 = vld [vmem:[%s2945_s26 + $0x8] sm:$0xff] }
   0xe   :  { %v74_v2 = vsel %vm73_vm0, %v69_v0, 0.0  ;;  %v77_v3 = vsel %vm73_vm0, %v70_v1, 0.0  ;;  %v2348_v15 = vld [vmem:[%s2946_s0 + $0x8] sm:$0xff]   ;;  %v2349_v16 = vld [vmem:[%s2946_s0] sm:$0xff]  }
   0xf   :  { %75 = vadd.xlane.f32.xlu0 %v74_v2  ;;  %2184 = vmatpush3.bf16.msra.mxu0 %v2348_v15  ;;  %v2004_v25 = vld [vmem:[%s2947_s23] ss:$0 sm:$0xff] }
  0x10   :  { %2185 = vmatprep.subr.bf16.mxu0 %v2434_v14  ;;  %v2005_v29 = vld [vmem:[%s2948_s3] ss:$0 sm:$0xff] }
  0x11   :  { %v2006_v34 = vld [vmem:[%s2949_s27] ss:$0 sm:$0xff] }
  0x12   :  { %v2623_v47 = vld [vmem:[%s2950_s1 + $0x8] sm:$0xff]  ;;  %v2628_v50 = vld [vmem:[%s2950_s1] sm:$0xff] }
  0x13   :  { %78 = vadd.xlane.f32.xlu0 %v77_v3  ;;  %2186 = vmatpush3.bf16.msra.mxu0 %v2349_v16 }
  0x98   :  { %v76_v4 = vpop.xlane.xlu0 %75 }
  0x99   :  { %v81_v5 = vmul.f32 0.03125, %v76_v4 }
  0x9b   :  { %v83_v6 = vsub.f32 %v69_v0, %v81_v5 }
  0x9c   :  { %v79_v7 = vpop.xlane.xlu0 %78 }
  0x9d   :  { %v82_v8 = vmul.f32 0.03125, %v79_v7  ;;  %v85_v9 = vmul.f32 %v83_v6, %v83_v6 }
  0x9f   :  { %v84_v10 = vsub.f32 %v70_v1, %v82_v8  ;;  %v87_v11 = vsel %vm73_vm0, %v85_v9, 0.0 }
  0xa0   :  { %88 = vadd.xlane.f32.xlu1 %v87_v11 }
  0xa1   :  { %v86_v12 = vmul.f32 %v84_v10, %v84_v10 }
  0xa3   :  { %v90_v13 = vsel %vm73_vm0, %v86_v12, 0.0 }
  0xa4   :  { %91 = vadd.xlane.f32.xlu1 %v90_v13 }
 0x129   :  { %v89_v17 = vpop.xlane.xlu1 %88 }
 0x12a   :  { %v93_v18 = vmul.f32 0.03125, %v89_v17 }
 0x12c   :  { %v95_v19 = vadd.f32 1e-12, %v93_v18 }
 0x12d   :  { %v92_v20 = vpop.xlane.xlu1 %91 }
 0x12e   :  { %2372 = vrsqrt.f32 %v95_v19  ;;  %v94_v21 = vmul.f32 0.03125, %v92_v20 }
 0x130   :  { %v96_v22 = vadd.f32 1e-12, %v94_v21 }
 0x132   :  { %2374 = vrsqrt.f32 %v96_v22 }
 0x13b   :  { %v2373_v23 = vpop.eup %2372 }
 0x13c   :  { %v99_v24 = vmul.f32 %v2373_v23, %v83_v6 }
 0x13e   :  { %v107_v28 = vmul.f32 %v2004_v25, %v99_v24 }
 0x13f   :  { %v2375_v26 = vpop.eup %2374 }
 0x140   :  { %v100_v27 = vmul.f32 %v2375_v26, %v84_v10  ;;  %v2577_v31 = vadd.f32 %v2005_v29, %v107_v28 }
 0x142   :  { %v108_v30 = vmul.f32 %v2004_v25, %v100_v27 }
 0x144   :  { %v2579_v32 = vadd.f32 %v2005_v29, %v108_v30 }
 0x146   :  { %v119_v33 = vpack.c.bf16 %v2579_v32, %v2577_v31 }
 0x148   :  { %2188 = vmatmul.mubr.msk.bf16.vlgmr.msra.gmra.mxu0 %vm73_vm0, %v119_v33 }
 0x208   :  { %v180_v35 = vpop.f32.mrf.mxu0 }
 0x209   :  { %v2587_v36 = vadd.f32 %v2006_v34, %v180_v35 }
 0x20a   :  { %v2189_v37 = vpop.f32.mrf.mxu0 }
 0x20b   :  { %193 = vrot.lane.b32.xlu1 %v2587_v36, %s2436_s4  ;;  %2195 = vmatprep.mubr.msk.f32.mxu1 %vm197_vm2, %v2587_v36  ;;  %v2351_v37 = vld [vmem:[%s2919_s7 + $0x8] sm:$0xff]  }
 0x20c   :  { %v183_v38 = vpop.f32.mrf.mxu0 }
 0x20d   :  { %v2593_v39 = vadd.f32 %v2006_v34, %v183_v38 }
 0x20e   :  { %v2190_v40 = vpop.f32.mrf.mxu0 }
 0x20f   :  { %397 = vrot.lane.b32.xlu1 %v2593_v39, %s2437_s28  ;;  %195 = vrot.lane.b32.xlu0 %v2593_v39, %s2436_s4 }
 0x213   :  { %395 = vrot.lane.b32.xlu1 %v2587_v36, %s2437_s28  ;;  %391 = vrot.lane.b32.xlu0 %v2587_v36, %s2438_s29 }
 0x217   :  { %393 = vrot.lane.b32.xlu1 %v2593_v39, %s2438_s29 }
 0x27d   :  { %v194_v41 = vpop.permute.xlu1 %193 }
 0x281   :  { %v398_v42 = vpop.permute.xlu1 %397  ;;  %v196_v43 = vpop.permute.xlu0 %195 }
 0x282   :  { %2191 = vmatprep.subr.msk.mxu1 %vm197_vm2, %v196_v43  ;;  %2205 = vmatprep.subr.msk.mxu0 %vm197_vm2, %v398_v42 }
 0x283   :  { %2192 = vmatpush3.xpose.msk.msra.mxu1 %vm197_vm2, %v196_v43  ;;  %2206 = vmatpush3.xpose.msk.msra.mxu0 %vm197_vm2, %v398_v42 }
 0x284   :  { %2193 = vmatprep.subr.msk.mxu1 %vm197_vm2, %v194_v41 }
 0x285   :  { %v396_v44 = vpop.permute.xlu1 %395  ;;  %v392_v45 = vpop.permute.xlu0 %391 }
 0x286   :  { %2207 = vmatprep.subr.msk.mxu0 %vm197_vm2, %v396_v44  ;;  %2209 = vmatprep.mubr.msk.f32.mxu0 %vm197_vm2, %v392_v45 }
 0x287   :  { %2194 = vmatpush3.xpose.msk.msra.mxu1 %vm197_vm2, %v194_v41  ;;  %2208 = vmatpush3.xpose.msk.msra.mxu0 %vm197_vm2, %v396_v44 }
 0x288   :  { %2219 = vmatprep.subr.bf16.mxu0 %v2434_v14 }
 0x289   :  { %v394_v46 = vpop.permute.xlu1 %393 }
 0x28a   :  { %2196 = vmatmul.mubr.msk.f32.vlgmr.msra.gmra.mxu1 %vm197_vm2, %v2593_v39  ;;  %2210 = vmatmul.mubr.msk.f32.vlgmr.msra.gmra.mxu0 %vm197_vm2, %v394_v46 }
 0x28b   :  { %2221 = vmatprep.mubr.msk.bf16.mxu0 %vm2435_vm1, %v2434_v14  ;;  %2220 = vmatpush3.bf16.msra.mxu0 %v2351_v37 }
 0x28c   :  { %2231 = vmatprep.subr.bf16.mxu0 %v2434_v14 }
 0x34a   :  { %v2197_v48 = vpop.f32.mrf.mxu1  ;;  %v2211_v49 = vpop.f32.mrf.mxu0 }
 0x34b   :  { %v278_v51 = vadd.f32 %v2197_v48, %v2623_v47  ;;  %v479_v58 = vadd.f32 %v2211_v49, %v2623_v47 }
 0x34c   :  { %v272_v52 = vpop.f32.mrf.mxu1  ;;  %v473_v53 = vpop.f32.mrf.mxu0 }
 0x34d   :  { %v273_v54 = vadd.f32 %v272_v52, %v2628_v50  ;;  %v284_v55 = vsel %vm197_vm2, %v278_v51, -inf  ;;  %v474_v56 = vadd.f32 %v473_v53, %v2628_v50  ;;  %v485_v60 = vsel %vm197_vm2, %v479_v58, -inf }
 0x34e   :  { %285 = vmax.xlane.f32.xlu1 %v284_v55 }
 0x34f   :  { %v281_v57 = vsel %vm197_vm2, %v273_v54, -inf  ;;  %v482_v59 = vsel %vm197_vm2, %v474_v56, -inf }
 0x350   :  { %282 = vmax.xlane.f32.xlu0 %v281_v57 }
 0x354   :  { %483 = vmax.xlane.f32.xlu0 %v482_v59 }
 0x358   :  { %486 = vmax.xlane.f32.xlu0 %v485_v60 }
 0x3d7   :  { %v286_v61 = vpop.xlane.xlu1 %285 }
 0x3d8   :  { %v288_v62 = vsub.f32 %v278_v51, %v286_v61  ;;  %v2026_v51 = vld [vmem:[%s2920_s8] ss:$0 sm:$0xff] }
 0x3d9   :  { %v283_v63 = vpop.xlane.xlu0 %282 }
 0x3da   :  { %v291_v0 = vmul.f32 1.442695, %v288_v62  ;;  %v287_v1 = vsub.f32 %v273_v54, %v283_v63 }
 0x3dc   :  { %2376 = vpow2.f32 %v291_v0  ;;  %v289_v2 = vmul.f32 1.442695, %v287_v1 }
 0x3dd   :  { %v484_v3 = vpop.xlane.xlu0 %483 }
 0x3de   :  { %2378 = vpow2.f32 %v289_v2  ;;  %v488_v4 = vsub.f32 %v474_v56, %v484_v3 }
 0x3e0   :  { %v490_v5 = vmul.f32 1.442695, %v488_v4 }
 0x3e1   :  { %v487_v6 = vpop.xlane.xlu0 %486 }
 0x3e2   :  { %2380 = vpow2.f32 %v490_v5  ;;  %v489_v7 = vsub.f32 %v479_v58, %v487_v6 }
 0x3e4   :  { %v492_v8 = vmul.f32 1.442695, %v489_v7 }
 0x3e6   :  { %2382 = vpow2.f32 %v492_v8  ;;  %v2353_v8 = vld [vmem:[%s2921_s11] sm:$0xff]  }
 0x3e9   :  { %v2377_v9 = vpop.eup %2376 }
 0x3ea   :  { %v296_v10 = vsel %vm197_vm2, %v2377_v9, 0.0 }
 0x3eb   :  { %v2379_v11 = vpop.eup %2378  ;;  %297 = vadd.xlane.f32.xlu1 %v296_v10 }
 0x3ec   :  { %v293_v12 = vsel %vm197_vm2, %v2379_v11, 0.0 }
 0x3ed   :  { %294 = vadd.xlane.f32.xlu0 %v293_v12 }
 0x3ef   :  { %v2381_v13 = vpop.eup %2380 }
 0x3f0   :  { %v494_v15 = vsel %vm197_vm2, %v2381_v13, 0.0 }
 0x3f1   :  { %495 = vadd.xlane.f32.xlu0 %v494_v15 }
 0x3f3   :  { %v2383_v16 = vpop.eup %2382 }
 0x3f4   :  { %v497_v17 = vsel %vm197_vm2, %v2383_v16, 0.0 }
 0x3f5   :  { %498 = vadd.xlane.f32.xlu1 %v497_v17 }
 0x406   :  { %303 = vrot.lane.b32.xlu1 %v2587_v36, %s2439_s5 }
 0x407   :  { %305 = vrot.lane.b32.xlu0 %v2593_v39, %s2439_s5 }
 0x40a   :  { %506 = vrot.lane.b32.xlu1 %v2593_v39, %s2440_s24 }
 0x40e   :  { %504 = vrot.lane.b32.xlu1 %v2587_v36, %s2440_s24  ;;  %v2350_v36 = vld [vmem:[%s2919_s7] sm:$0xff]  }
 0x474   :  { %v298_v18 = vpop.xlane.xlu1 %297 }
 0x475   :  { %2384 = vrcp.f32 %v298_v18  ;;  %v2027_v18 = vld [vmem:[%s2922_s9] ss:$0 sm:$0xff] }
 0x476   :  { %v295_v19 = vpop.xlane.xlu0 %294 }
 0x477   :  { %2386 = vrcp.f32 %v295_v19 }
 0x47a   :  { %v496_v20 = vpop.xlane.xlu0 %495 }
 0x47b   :  { %2388 = vrcp.f32 %v496_v20 }
 0x47e   :  { %v499_v21 = vpop.xlane.xlu1 %498  ;;  %v306_v22 = vpop.permute.xlu0 %305 }
 0x47f   :  { %2390 = vrcp.f32 %v499_v21  ;;  %2198 = vmatprep.subr.mxu1 %v306_v22 }
 0x480   :  { %2199 = vmatpush3.msra.mxu1 %v306_v22  ;;  %v2028_v22 = vld [vmem:[%s2923_s10] ss:$0 sm:$0xff] }
 0x482   :  { %v304_v23 = vpop.permute.xlu1 %303  ;;  %v2385_v24 = vpop.eup %2384 }
 0x483   :  { %2200 = vmatprep.subr.mxu1 %v304_v23  ;;  %v302_v28 = vmul.f32 %v2385_v24, %v2377_v9 }
 0x484   :  { %v2387_v25 = vpop.eup %2386  ;;  %2201 = vmatpush3.msra.mxu1 %v304_v23 }
 0x485   :  { %v301_v26 = vmul.f32 %v2387_v25, %v2379_v11 }
 0x486   :  { %v507_v27 = vpop.permute.xlu1 %506 }
 0x487   :  { %2202 = vmatprep.mubr.msk.f32.mxu1 %vm197_vm2, %v301_v26  ;;  %2212 = vmatprep.subr.mxu1 %v507_v27 }
 0x488   :  { %v2389_v29 = vpop.eup %2388  ;;  %2203 = vmatmul.mubr.msk.f32.vlgmr.msra.gmra.mxu1 %vm197_vm2, %v302_v28  ;;  %v2355_v28 = vld [vmem:[%s2924_s13 + $0x10] sm:$0xff]  }
 0x489   :  { %2213 = vmatpush3.msra.mxu1 %v507_v27  ;;  %v502_v30 = vmul.f32 %v2389_v29, %v2381_v13  ;;  %v2354_v27 = vld [vmem:[%s2924_s13 + $0x18] sm:$0xff]   ;;  %v2356_v29 = vld [vmem:[%s2924_s13 + $0x8] sm:$0xff]  }
 0x48a   :  { %v505_v33 = vpop.permute.xlu1 %504 }
 0x48b   :  { %2214 = vmatprep.subr.mxu1 %v505_v33  ;;  %2216 = vmatprep.mubr.msk.f32.mxu1 %vm197_vm2, %v502_v30  ;;  %v2357_v30 = vld [vmem:[%s2924_s13] sm:$0xff]  }
 0x48c   :  { %v2391_v34 = vpop.eup %2390  ;;  %2215 = vmatpush3.msra.mxu1 %v505_v33  ;;  %v2029_v33 = vld [vmem:[%s2925_s12] ss:$0 sm:$0xff] }
 0x48d   :  { %v503_v35 = vmul.f32 %v2391_v34, %v2383_v16  ;;  %2225 = vmatprep.subr.bf16.mxu1 %v2434_v14 }
 0x48f   :  { %2217 = vmatmul.mubr.msk.f32.vlgmr.msra.gmra.mxu1 %vm197_vm2, %v503_v35 }
 0x490   :  { %2227 = vmatprep.mubr.msk.bf16.mxu1 %vm2435_vm1, %v2434_v14  ;;  %2226 = vmatpush3.bf16.msra.mxu1 %v2350_v36 }
 0x491   :  { %2239 = vmatprep.subr.bf16.mxu1 %v2434_v14 }
 0x548   :  { %v2204_v38 = vpop.f32.mrf.mxu1 }
 0x54a   :  { %v381_v39 = vpop.f32.mrf.mxu1 }
 0x54b   :  { %v390_v40 = vpack.c.bf16 %v2204_v38, %v381_v39 }
 0x54d   :  { %2228 = vmatmul.mubr.msk.bf16.vlgmr.msra.gmra.mxu1 %vm197_vm2, %v390_v40 }
 0x54e   :  { %2247 = vmatprep.mubr.msk.bf16.mxu1 %vm2435_vm1, %v2434_v14  ;;  %2240 = vmatpush3.bf16.msra.mxu1 %v2354_v27  ;;  %v2039_v27 = vld [vmem:[%s2927_s15] ss:$0 sm:$0xff] }
 0x54f   :  { %v2218_v41 = vpop.f32.mrf.mxu1  ;;  %2241 = vmatprep.subr.bf16.mxu1 %v2434_v14 }
 0x551   :  { %v582_v42 = vpop.f32.mrf.mxu1 }
 0x552   :  { %v591_v43 = vpack.c.bf16 %v2218_v41, %v582_v42  ;;  %2242 = vmatpush3.bf16.msra.mxu1 %v2355_v28 }
 0x553   :  { %2243 = vmatprep.subr.bf16.mxu1 %v2434_v14 }
 0x554   :  { %2222 = vmatmul.mubr.msk.bf16.vlgmr.msra.gmra.mxu0 %vm197_vm2, %v591_v43 }
 0x555   :  { %2235 = vmatprep.mubr.msk.bf16.mxu0 %vm2435_vm1, %v2434_v14 }
 0x556   :  { %2244 = vmatpush3.bf16.msra.mxu1 %v2356_v29 }
 0x557   :  { %2245 = vmatprep.subr.bf16.mxu1 %v2434_v14 }
 0x55a   :  { %2246 = vmatpush3.bf16.msra.mxu1 %v2357_v30 }
 0x60d   :  { %v685_v44 = vpop.f32.mrf.mxu1 }
 0x60f   :  { %v2229_v45 = vpop.f32.mrf.mxu1 }
 0x611   :  { %v688_v46 = vpop.f32.mrf.mxu1 }
 0x613   :  { %v2230_v48 = vpop.f32.mrf.mxu1 }
 0x614   :  { %v635_v49 = vpop.f32.mrf.mxu0 }
 0x615   :  { %v686_v52 = vadd.f32 %v685_v44, %v635_v49 }
 0x616   :  { %v2223_v53 = vpop.f32.mrf.mxu0 }
 0x617   :  { %v699_v54 = vadd.f32 %v2026_v51, %v686_v52 }
 0x618   :  { %v638_v55 = vpop.f32.mrf.mxu0 }
 0x619   :  { %v689_v56 = vadd.f32 %v688_v46, %v638_v55  ;;  %v701_v57 = vadd.f32 %v699_v54, %v2577_v31 }
 0x61a   :  { %v2224_v58 = vpop.f32.mrf.mxu0 }
 0x61b   :  { %v700_v59 = vadd.f32 %v2026_v51, %v689_v56  ;;  %v705_v60 = vsel %vm73_vm0, %v701_v57, 0.0 }
 0x61c   :  { %706 = vadd.xlane.f32.xlu0 %v705_v60 }
 0x61d   :  { %v702_v61 = vadd.f32 %v700_v59, %v2579_v32  ;;  %v2352_v32 = vld [vmem:[%s2921_s11 + $0x8] sm:$0xff]  }
 0x61e   :  { %2232 = vmatpush3.bf16.msra.mxu0 %v2352_v32 }
 0x61f   :  { %v708_v62 = vsel %vm73_vm0, %v702_v61, 0.0  ;;  %2233 = vmatprep.subr.bf16.mxu0 %v2434_v14 }
 0x620   :  { %709 = vadd.xlane.f32.xlu1 %v708_v62 }
 0x622   :  { %2234 = vmatpush3.bf16.msra.mxu0 %v2353_v8 }
 0x623   :  { %2251 = vmatprep.subr.bf16.mxu0 %v2434_v14 }
 0x6a5   :  { %v707_v63 = vpop.xlane.xlu0 %706 }
 0x6a6   :  { %v711_v0 = vmul.f32 0.03125, %v707_v63 }
 0x6a8   :  { %v713_v1 = vsub.f32 %v701_v57, %v711_v0 }
 0x6a9   :  { %v710_v2 = vpop.xlane.xlu1 %709 }
 0x6aa   :  { %v712_v3 = vmul.f32 0.03125, %v710_v2  ;;  %v715_v4 = vmul.f32 %v713_v1, %v713_v1 }
 0x6ac   :  { %v714_v5 = vsub.f32 %v702_v61, %v712_v3  ;;  %v717_v6 = vsel %vm73_vm0, %v715_v4, 0.0  ;;  %v2033_v61 = vld [vmem:[%s2926_s14] ss:$0 sm:$0xff] }
 0x6ad   :  { %718 = vadd.xlane.f32.xlu0 %v717_v6 }
 0x6ae   :  { %v716_v31 = vmul.f32 %v714_v5, %v714_v5 }
 0x6b0   :  { %v720_v7 = vsel %vm73_vm0, %v716_v31, 0.0 }
 0x6b1   :  { %721 = vadd.xlane.f32.xlu0 %v720_v7 }
 0x736   :  { %v719_v9 = vpop.xlane.xlu0 %718 }
 0x737   :  { %v723_v10 = vmul.f32 0.03125, %v719_v9 }
 0x739   :  { %v725_v11 = vadd.f32 1e-12, %v723_v10 }
 0x73a   :  { %v722_v12 = vpop.xlane.xlu0 %721 }
 0x73b   :  { %2392 = vrsqrt.f32 %v725_v11  ;;  %v724_v13 = vmul.f32 0.03125, %v722_v12 }
 0x73d   :  { %v726_v15 = vadd.f32 1e-12, %v724_v13 }
 0x73f   :  { %2394 = vrsqrt.f32 %v726_v15 }
 0x748   :  { %v2393_v16 = vpop.eup %2392 }
 0x749   :  { %v729_v17 = vmul.f32 %v2393_v16, %v713_v1 }
 0x74b   :  { %v737_v21 = vmul.f32 %v2027_v18, %v729_v17  ;;  %v2358_v17 = vld [vmem:[%s2946_s0 + $0x18] sm:$0xff]  }
 0x74c   :  { %v2395_v19 = vpop.eup %2394 }
 0x74d   :  { %v730_v20 = vmul.f32 %v2395_v19, %v714_v5  ;;  %v745_v24 = vadd.f32 %v2028_v22, %v737_v21 }
 0x74f   :  { %v738_v23 = vmul.f32 %v2027_v18, %v730_v20  ;;  %v2359_v18 = vld [vmem:[%s2946_s0 + $0x10] sm:$0xff]  }
 0x751   :  { %v746_v25 = vadd.f32 %v2028_v22, %v738_v23 }
 0x753   :  { %v747_v26 = vpack.c.bf16 %v746_v25, %v745_v24 }
 0x755   :  { %2236 = vmatmul.mubr.msk.bf16.vlgmr.msra.gmra.mxu0 %vm73_vm0, %v747_v26 }
 0x756   :  { %2255 = vmatprep.mubr.msk.bf16.mxu0 %vm2435_vm1, %v2434_v14  ;;  %2252 = vmatpush3.bf16.msra.mxu0 %v2358_v17 }
 0x757   :  { %2253 = vmatprep.subr.bf16.mxu0 %v2434_v14 }
 0x75a   :  { %2254 = vmatpush3.bf16.msra.mxu0 %v2359_v18 }
 0x815   :  { %v808_v34 = vpop.f32.mrf.mxu0 }
 0x816   :  { %v809_v35 = vadd.f32 %v2029_v33, %v808_v34 }
 0x817   :  { %v2237_v36 = vpop.f32.mrf.mxu0 }
 0x818   :  { %v817_v37 = vmul.f32 0.044715, %v809_v35  ;;  %v815_v55 = vmul.f32 0.5, %v809_v35 }
 0x819   :  { %v811_v38 = vpop.f32.mrf.mxu0 }
 0x81a   :  { %v819_v39 = vmul.f32 %v817_v37, %v809_v35  ;;  %v812_v40 = vadd.f32 %v2029_v33, %v811_v38  ;;  %v2040_v33 = vld [vmem:[%s2928_s16] ss:$0 sm:$0xff]  ;;  %v2046_v38 = vld [vmem:[%s2949_s27 + $0x1] ss:$0 sm:$0xff] }
 0x81b   :  { %v2238_v41 = vpop.f32.mrf.mxu0 }
 0x81c   :  { %v821_v42 = vmul.f32 %v819_v39, %v809_v35  ;;  %v818_v43 = vmul.f32 0.044715, %v812_v40  ;;  %v816_v56 = vmul.f32 0.5, %v812_v40 }
 0x81e   :  { %v823_v44 = vadd.f32 %v821_v42, %v809_v35  ;;  %v820_v45 = vmul.f32 %v818_v43, %v812_v40 }
 0x820   :  { %v825_v46 = vmul.f32 0.7978846, %v823_v44  ;;  %v822_v48 = vmul.f32 %v820_v45, %v812_v40 }
 0x822   :  { %2396 = vtanh.f32 %v825_v46  ;;  %v824_v49 = vadd.f32 %v822_v48, %v812_v40 }
 0x824   :  { %v826_v51 = vmul.f32 0.7978846, %v824_v49 }
 0x826   :  { %2398 = vtanh.f32 %v826_v51 }
 0x82f   :  { %v2397_v52 = vpop.eup %2396 }
 0x830   :  { %v829_v53 = vadd.f32 1.0, %v2397_v52 }
 0x832   :  { %v831_v58 = vmul.f32 %v829_v53, %v815_v55 }
 0x833   :  { %v2399_v54 = vpop.eup %2398 }
 0x834   :  { %v830_v57 = vadd.f32 1.0, %v2399_v54 }
 0x836   :  { %v832_v59 = vmul.f32 %v830_v57, %v816_v56 }
 0x838   :  { %v833_v60 = vpack.c.bf16 %v832_v59, %v831_v58 }
 0x83a   :  { %2248 = vmatmul.mubr.msk.bf16.vlgmr.msra.gmra.mxu1 %vm873_vm3, %v833_v60 }
 0x8fa   :  { %v911_v62 = vpop.f32.mrf.mxu1 }
 0x8fb   :  { %v912_v63 = vadd.f32 %v2033_v61, %v911_v62 }
 0x8fc   :  { %v2249_v0 = vpop.f32.mrf.mxu1 }
 0x8fd   :  { %v918_v1 = vadd.f32 %v912_v63, %v745_v24 }
 0x8fe   :  { %v914_v2 = vpop.f32.mrf.mxu1 }
 0x8ff   :  { %v915_v3 = vadd.f32 %v2033_v61, %v914_v2  ;;  %v922_v4 = vsel %vm73_vm0, %v918_v1, 0.0 }
 0x900   :  { %923 = vadd.xlane.f32.xlu0 %v922_v4  ;;  %v2250_v5 = vpop.f32.mrf.mxu1 }
 0x901   :  { %v919_v6 = vadd.f32 %v915_v3, %v746_v25 }
 0x903   :  { %v925_v31 = vsel %vm73_vm0, %v919_v6, 0.0 }
 0x904   :  { %926 = vadd.xlane.f32.xlu1 %v925_v31 }
 0x989   :  { %v924_v7 = vpop.xlane.xlu0 %923 }
 0x98a   :  { %v928_v32 = vmul.f32 0.03125, %v924_v7 }
 0x98c   :  { %v930_v8 = vsub.f32 %v918_v1, %v928_v32 }
 0x98d   :  { %v927_v9 = vpop.xlane.xlu1 %926 }
 0x98e   :  { %v929_v10 = vmul.f32 0.03125, %v927_v9  ;;  %v932_v11 = vmul.f32 %v930_v8, %v930_v8 }
 0x990   :  { %v931_v12 = vsub.f32 %v919_v6, %v929_v10  ;;  %v934_v13 = vsel %vm73_vm0, %v932_v11, 0.0 }
 0x991   :  { %935 = vadd.xlane.f32.xlu0 %v934_v13 }
 0x992   :  { %v933_v15 = vmul.f32 %v931_v12, %v931_v12 }
 0x994   :  { %v937_v16 = vsel %vm73_vm0, %v933_v15, 0.0 }
 0x995   :  { %938 = vadd.xlane.f32.xlu1 %v937_v16 }
 0xa1a   :  { %v936_v19 = vpop.xlane.xlu0 %935 }
 0xa1b   :  { %v940_v20 = vmul.f32 0.03125, %v936_v19 }
 0xa1d   :  { %v942_v21 = vadd.f32 1e-12, %v940_v20 }
 0xa1e   :  { %v939_v22 = vpop.xlane.xlu1 %938 }
 0xa1f   :  { %2400 = vrsqrt.f32 %v942_v21  ;;  %v941_v23 = vmul.f32 0.03125, %v939_v22 }
 0xa21   :  { %v943_v24 = vadd.f32 1e-12, %v941_v23 }
 0xa23   :  { %2402 = vrsqrt.f32 %v943_v24 }
 0xa2c   :  { %v2401_v25 = vpop.eup %2400 }
 0xa2d   :  { %v946_v26 = vmul.f32 %v2401_v25, %v930_v8 }
 0xa2f   :  { %v954_v30 = vmul.f32 %v2039_v27, %v946_v26 }
 0xa30   :  { %v2403_v28 = vpop.eup %2402 }
 0xa31   :  { %v947_v29 = vmul.f32 %v2403_v28, %v931_v12  ;;  %v2736_v35 = vadd.f32 %v2040_v33, %v954_v30 }
 0xa33   :  { %v955_v34 = vmul.f32 %v2039_v27, %v947_v29 }
 0xa35   :  { %v2738_v36 = vadd.f32 %v2040_v33, %v955_v34 }
 0xa37   :  { %v964_v37 = vpack.c.bf16 %v2738_v36, %v2736_v35 }
 0xa39   :  { %2256 = vmatmul.mubr.msk.bf16.vlgmr.msra.gmra.mxu0 %vm73_vm0, %v964_v37 }
 0xaf9   :  { %v1027_v39 = vpop.f32.mrf.mxu0 }
 0xafa   :  { %v2746_v40 = vadd.f32 %v2046_v38, %v1027_v39  ;;  %v2361_v39 = vld [vmem:[%s2919_s7 + $0x18] sm:$0xff]  }
 0xafb   :  { %v2257_v41 = vpop.f32.mrf.mxu0 }
 0xafc   :  { %1041 = vrot.lane.b32.xlu1 %v2746_v40, %s2436_s4  ;;  %2263 = vmatprep.mubr.msk.f32.mxu0 %vm197_vm2, %v2746_v40 }
 0xafd   :  { %v1030_v42 = vpop.f32.mrf.mxu0 }
 0xafe   :  { %v2752_v43 = vadd.f32 %v2046_v38, %v1030_v42  ;;  %v2360_v38 = vld [vmem:[%s2919_s7 + $0x10] sm:$0xff]  }
 0xaff   :  { %v2258_v44 = vpop.f32.mrf.mxu0 }
 0xb00   :  { %1244 = vrot.lane.b32.xlu1 %v2752_v43, %s2437_s28  ;;  %1043 = vrot.lane.b32.xlu0 %v2752_v43, %s2436_s4 }
 0xb04   :  { %1242 = vrot.lane.b32.xlu1 %v2746_v40, %s2437_s28  ;;  %1238 = vrot.lane.b32.xlu0 %v2746_v40, %s2438_s29 }
 0xb08   :  { %1240 = vrot.lane.b32.xlu1 %v2752_v43, %s2438_s29 }
 0xb6e   :  { %v1042_v45 = vpop.permute.xlu1 %1041 }
 0xb72   :  { %v1044_v46 = vpop.permute.xlu0 %1043  ;;  %v1245_v48 = vpop.permute.xlu1 %1244 }
 0xb73   :  { %2259 = vmatprep.subr.msk.mxu0 %vm197_vm2, %v1044_v46 }
 0xb74   :  { %2260 = vmatpush3.xpose.msk.msra.mxu0 %vm197_vm2, %v1044_v46 }
 0xb75   :  { %2261 = vmatprep.subr.msk.mxu0 %vm197_vm2, %v1042_v45 }
 0xb76   :  { %v1239_v49 = vpop.permute.xlu0 %1238  ;;  %v1243_v51 = vpop.permute.xlu1 %1242 }
 0xb78   :  { %2262 = vmatpush3.xpose.msk.msra.mxu0 %vm197_vm2, %v1042_v45 }
 0xb79   :  { %2273 = vmatprep.subr.msk.mxu0 %vm197_vm2, %v1245_v48 }
 0xb7a   :  { %v1241_v52 = vpop.permute.xlu1 %1240 }
 0xb7b   :  { %2264 = vmatmul.mubr.msk.f32.vlgmr.msra.gmra.mxu0 %vm197_vm2, %v2752_v43 }
 0xb7c   :  { %2274 = vmatpush3.xpose.msk.msra.mxu0 %vm197_vm2, %v1245_v48  ;;  %2277 = vmatprep.mubr.msk.f32.mxu0 %vm197_vm2, %v1239_v49 }
 0xb7d   :  { %2275 = vmatprep.subr.msk.mxu0 %vm197_vm2, %v1243_v51 }
 0xb80   :  { %2276 = vmatpush3.xpose.msk.msra.mxu0 %vm197_vm2, %v1243_v51 }
 0xb81   :  { %2293 = vmatprep.subr.bf16.mxu0 %v2434_v14 }
 0xb83   :  { %2278 = vmatmul.mubr.msk.f32.vlgmr.msra.gmra.mxu0 %vm197_vm2, %v1241_v52 }
 0xb84   :  { %2295 = vmatprep.mubr.msk.bf16.mxu0 %vm2435_vm1, %v2434_v14  ;;  %2294 = vmatpush3.bf16.msra.mxu0 %v2360_v38 }
 0xb85   :  { %2307 = vmatprep.subr.bf16.mxu0 %v2434_v14 }
 0xc3b   :  { %v2265_v53 = vpop.f32.mrf.mxu0 }
 0xc3c   :  { %v1125_v54 = vadd.f32 %v2265_v53, %v2623_v47  ;;  %v2071_v53 = vld [vmem:[%s2920_s8 + $0x1] ss:$0 sm:$0xff] }
 0xc3d   :  { %v1119_v55 = vpop.f32.mrf.mxu0 }
 0xc3e   :  { %v1120_v56 = vadd.f32 %v1119_v55, %v2628_v50  ;;  %v1131_v57 = vsel %vm197_vm2, %v1125_v54, -inf }
 0xc3f   :  { %1132 = vmax.xlane.f32.xlu1 %v1131_v57 }
 0xc40   :  { %v1128_v58 = vsel %vm197_vm2, %v1120_v56, -inf }
 0xc41   :  { %1129 = vmax.xlane.f32.xlu0 %v1128_v58 }
 0xc43   :  { %v2279_v59 = vpop.f32.mrf.mxu0 }
 0xc44   :  { %v1326_v62 = vadd.f32 %v2279_v59, %v2623_v47 }
 0xc45   :  { %v1320_v60 = vpop.f32.mrf.mxu0 }
 0xc46   :  { %v1321_v61 = vadd.f32 %v1320_v60, %v2628_v50  ;;  %v1332_v0 = vsel %vm197_vm2, %v1326_v62, -inf }
 0xc48   :  { %v1329_v63 = vsel %vm197_vm2, %v1321_v61, -inf }
 0xc49   :  { %1330 = vmax.xlane.f32.xlu0 %v1329_v63 }
 0xc4d   :  { %1333 = vmax.xlane.f32.xlu0 %v1332_v0 }
 0xcc8   :  { %v1133_v1 = vpop.xlane.xlu1 %1132 }
 0xcc9   :  { %v1135_v2 = vsub.f32 %v1125_v54, %v1133_v1 }
 0xcca   :  { %v1130_v3 = vpop.xlane.xlu0 %1129 }
 0xccb   :  { %v1138_v4 = vmul.f32 1.442695, %v1135_v2  ;;  %v1134_v5 = vsub.f32 %v1120_v56, %v1130_v3 }
 0xccd   :  { %2404 = vpow2.f32 %v1138_v4  ;;  %v1136_v6 = vmul.f32 1.442695, %v1134_v5 }
 0xccf   :  { %2406 = vpow2.f32 %v1136_v6 }
 0xcd2   :  { %v1331_v31 = vpop.xlane.xlu0 %1330 }
 0xcd3   :  { %v1335_v7 = vsub.f32 %v1321_v61, %v1331_v31 }
 0xcd5   :  { %v1337_v32 = vmul.f32 1.442695, %v1335_v7 }
 0xcd6   :  { %v1334_v50 = vpop.xlane.xlu0 %1333 }
 0xcd7   :  { %2408 = vpow2.f32 %v1337_v32  ;;  %v1336_v47 = vsub.f32 %v1326_v62, %v1334_v50  ;;  %v2363_v50 = vld [vmem:[%s2921_s11 + $0x10] sm:$0xff]  }
 0xcd9   :  { %v1339_v8 = vmul.f32 1.442695, %v1336_v47 }
 0xcda   :  { %v2405_v9 = vpop.eup %2404 }
 0xcdb   :  { %2410 = vpow2.f32 %v1339_v8  ;;  %v1143_v10 = vsel %vm197_vm2, %v2405_v9, 0.0 }
 0xcdc   :  { %v2407_v11 = vpop.eup %2406  ;;  %1144 = vadd.xlane.f32.xlu1 %v1143_v10 }
 0xcdd   :  { %v1140_v12 = vsel %vm197_vm2, %v2407_v11, 0.0 }
 0xcde   :  { %1141 = vadd.xlane.f32.xlu0 %v1140_v12 }
 0xce4   :  { %v2409_v13 = vpop.eup %2408 }
 0xce5   :  { %v1341_v15 = vsel %vm197_vm2, %v2409_v13, 0.0 }
 0xce6   :  { %1342 = vadd.xlane.f32.xlu0 %v1341_v15 }
 0xce8   :  { %v2411_v16 = vpop.eup %2410 }
 0xce9   :  { %v1344_v17 = vsel %vm197_vm2, %v2411_v16, 0.0 }
 0xcea   :  { %1345 = vadd.xlane.f32.xlu1 %v1344_v17 }
 0xcfb   :  { %1150 = vrot.lane.b32.xlu1 %v2746_v40, %s2439_s5 }
 0xcfc   :  { %1152 = vrot.lane.b32.xlu0 %v2752_v43, %s2439_s5 }
 0xcff   :  { %1353 = vrot.lane.b32.xlu1 %v2752_v43, %s2440_s24 }
 0xd03   :  { %1351 = vrot.lane.b32.xlu1 %v2746_v40, %s2440_s24 }
 0xd65   :  { %v1145_v18 = vpop.xlane.xlu1 %1144 }
 0xd66   :  { %2412 = vrcp.f32 %v1145_v18 }
 0xd67   :  { %v1142_v19 = vpop.xlane.xlu0 %1141 }
 0xd68   :  { %2414 = vrcp.f32 %v1142_v19 }
 0xd6f   :  { %v1343_v20 = vpop.xlane.xlu0 %1342 }
 0xd70   :  { %2416 = vrcp.f32 %v1343_v20  ;;  %v2075_v20 = vld [vmem:[%s2923_s10 + $0x1] ss:$0 sm:$0xff] }
 0xd73   :  { %v1346_v21 = vpop.xlane.xlu1 %1345  ;;  %v1153_v22 = vpop.permute.xlu0 %1152 }
 0xd74   :  { %v2413_v23 = vpop.eup %2412  ;;  %2418 = vrcp.f32 %v1346_v21  ;;  %2266 = vmatprep.subr.mxu1 %v1153_v22 }
 0xd75   :  { %v2415_v24 = vpop.eup %2414  ;;  %2267 = vmatpush3.msra.mxu1 %v1153_v22  ;;  %v1149_v27 = vmul.f32 %v2413_v23, %v2405_v9 }
 0xd76   :  { %v1148_v25 = vmul.f32 %v2415_v24, %v2407_v11 }
 0xd77   :  { %v1151_v26 = vpop.permute.xlu1 %1150 }
 0xd78   :  { %2268 = vmatprep.subr.mxu1 %v1151_v26  ;;  %2270 = vmatprep.mubr.msk.f32.mxu1 %vm197_vm2, %v1148_v25  ;;  %v2364_v25 = vld [vmem:[%s2924_s13 + $0x38] sm:$0xff]  }
 0xd79   :  { %2269 = vmatpush3.msra.mxu1 %v1151_v26  ;;  %v2365_v26 = vld [vmem:[%s2924_s13 + $0x30] sm:$0xff]  }
 0xd7a   :  { %2271 = vmatmul.mubr.msk.f32.vlgmr.msra.gmra.mxu1 %vm197_vm2, %v1149_v27  ;;  %v2366_v27 = vld [vmem:[%s2924_s13 + $0x28] sm:$0xff]  }
 0xd7b   :  { %v1354_v28 = vpop.permute.xlu1 %1353 }
 0xd7c   :  { %2280 = vmatprep.subr.mxu1 %v1354_v28 }
 0xd7d   :  { %v2417_v29 = vpop.eup %2416  ;;  %2281 = vmatpush3.msra.mxu1 %v1354_v28  ;;  %v2367_v28 = vld [vmem:[%s2924_s13 + $0x20] sm:$0xff]  }
 0xd7e   :  { %v1349_v30 = vmul.f32 %v2417_v29, %v2409_v13  ;;  %v2081_v29 = vld [vmem:[%s2925_s12 + $0x1] ss:$0 sm:$0xff] }
 0xd7f   :  { %v1352_v33 = vpop.permute.xlu1 %1351 }
 0xd80   :  { %2282 = vmatprep.subr.mxu1 %v1352_v33  ;;  %2284 = vmatprep.mubr.msk.f32.mxu1 %vm197_vm2, %v1349_v30 }
 0xd81   :  { %v2419_v34 = vpop.eup %2418  ;;  %2283 = vmatpush3.msra.mxu1 %v1352_v33 }
 0xd82   :  { %v1350_v37 = vmul.f32 %v2419_v34, %v2411_v16  ;;  %2287 = vmatprep.subr.bf16.mxu1 %v2434_v14  ;;  %v2074_v16 = vld [vmem:[%s2922_s9 + $0x1] ss:$0 sm:$0xff] }
 0xd84   :  { %2285 = vmatmul.mubr.msk.f32.vlgmr.msra.gmra.mxu1 %vm197_vm2, %v1350_v37 }
 0xd85   :  { %2289 = vmatprep.mubr.msk.bf16.mxu1 %vm2435_vm1, %v2434_v14  ;;  %2288 = vmatpush3.bf16.msra.mxu1 %v2361_v39 }
 0xd86   :  { %2299 = vmatprep.subr.bf16.mxu1 %v2434_v14 }
 0xe3a   :  { %v2272_v40 = vpop.f32.mrf.mxu1 }
 0xe3c   :  { %v1228_v41 = vpop.f32.mrf.mxu1 }
 0xe3d   :  { %v1237_v42 = vpack.c.bf16 %v2272_v40, %v1228_v41 }
 0xe3f   :  { %2296 = vmatmul.mubr.msk.bf16.vlgmr.msra.gmra.mxu0 %vm197_vm2, %v1237_v42 }
 0xe40   :  { %2315 = vmatprep.mubr.msk.bf16.mxu0 %vm2435_vm1, %v2434_v14  ;;  %2308 = vmatpush3.bf16.msra.mxu0 %v2364_v25  ;;  %v2103_v25 = vld [vmem:[%s2928_s16 + $0x1] ss:$0 sm:$0xff] }
 0xe41   :  { %2309 = vmatprep.subr.bf16.mxu0 %v2434_v14 }
 0xe44   :  { %v2286_v43 = vpop.f32.mrf.mxu1  ;;  %2310 = vmatpush3.bf16.msra.mxu0 %v2365_v26 }
 0xe45   :  { %2311 = vmatprep.subr.bf16.mxu0 %v2434_v14 }
 0xe46   :  { %v1429_v44 = vpop.f32.mrf.mxu1 }
 0xe47   :  { %v1438_v45 = vpack.c.bf16 %v2286_v43, %v1429_v44 }
 0xe48   :  { %2312 = vmatpush3.bf16.msra.mxu0 %v2366_v27 }
 0xe49   :  { %2290 = vmatmul.mubr.msk.bf16.vlgmr.msra.gmra.mxu1 %vm197_vm2, %v1438_v45  ;;  %2313 = vmatprep.subr.bf16.mxu0 %v2434_v14 }
 0xe4a   :  { %2303 = vmatprep.mubr.msk.bf16.mxu1 %vm2435_vm1, %v2434_v14 }
 0xe4c   :  { %2314 = vmatpush3.bf16.msra.mxu0 %v2367_v28 }
 0xe4d   :  { %2333 = vmatprep.subr.bf16.mxu0 %v2434_v14 }
 0xeff   :  { %v1532_v46 = vpop.f32.mrf.mxu0 }
 0xf01   :  { %v2297_v48 = vpop.f32.mrf.mxu0 }
 0xf03   :  { %v1535_v49 = vpop.f32.mrf.mxu0 }
 0xf05   :  { %v2298_v51 = vpop.f32.mrf.mxu0 }
 0xf09   :  { %v1482_v52 = vpop.f32.mrf.mxu1 }
 0xf0a   :  { %v1533_v54 = vadd.f32 %v1532_v46, %v1482_v52 }
 0xf0b   :  { %v2291_v55 = vpop.f32.mrf.mxu1 }
 0xf0c   :  { %v1547_v56 = vadd.f32 %v2071_v53, %v1533_v54 }
 0xf0d   :  { %v1485_v57 = vpop.f32.mrf.mxu1 }
 0xf0e   :  { %v1536_v58 = vadd.f32 %v1535_v49, %v1485_v57  ;;  %v1549_v59 = vadd.f32 %v1547_v56, %v2736_v35 }
 0xf0f   :  { %v2292_v60 = vpop.f32.mrf.mxu1 }
 0xf10   :  { %v1548_v61 = vadd.f32 %v2071_v53, %v1536_v58  ;;  %v1555_v62 = vsel %vm73_vm0, %v1549_v59, 0.0 }
 0xf11   :  { %1556 = vadd.xlane.f32.xlu0 %v1555_v62 }
 0xf12   :  { %v1550_v63 = vadd.f32 %v1548_v61, %v2738_v36  ;;  %v2362_v36 = vld [vmem:[%s2921_s11 + $0x18] sm:$0xff]   ;;  %v2094_v61 = vld [vmem:[%s2926_s14 + $0x1] ss:$0 sm:$0xff] }
 0xf13   :  { %2300 = vmatpush3.bf16.msra.mxu1 %v2362_v36 }
 0xf14   :  { %v1558_v0 = vsel %vm73_vm0, %v1550_v63, 0.0  ;;  %2301 = vmatprep.subr.bf16.mxu1 %v2434_v14 }
 0xf15   :  { %1559 = vadd.xlane.f32.xlu1 %v1558_v0 }
 0xf17   :  { %2302 = vmatpush3.bf16.msra.mxu1 %v2363_v50 }
 0xf18   :  { %2319 = vmatprep.subr.bf16.mxu1 %v2434_v14 }
 0xf9a   :  { %v1557_v1 = vpop.xlane.xlu0 %1556 }
 0xf9b   :  { %v1561_v2 = vmul.f32 0.03125, %v1557_v1 }
 0xf9d   :  { %v1563_v3 = vsub.f32 %v1549_v59, %v1561_v2 }
 0xf9e   :  { %v1560_v4 = vpop.xlane.xlu1 %1559 }
 0xf9f   :  { %v1562_v5 = vmul.f32 0.03125, %v1560_v4  ;;  %v1565_v6 = vmul.f32 %v1563_v3, %v1563_v3 }
 0xfa1   :  { %v1564_v31 = vsub.f32 %v1550_v63, %v1562_v5  ;;  %v1567_v7 = vsel %vm73_vm0, %v1565_v6, 0.0 }
 0xfa2   :  { %1568 = vadd.xlane.f32.xlu0 %v1567_v7 }
 0xfa3   :  { %v1566_v35 = vmul.f32 %v1564_v31, %v1564_v31 }
 0xfa5   :  { %v1570_v32 = vsel %vm73_vm0, %v1566_v35, 0.0 }
 0xfa6   :  { %1571 = vadd.xlane.f32.xlu0 %v1570_v32 }
0x102b   :  { %v1569_v47 = vpop.xlane.xlu0 %1568 }
0x102c   :  { %v1573_v8 = vmul.f32 0.03125, %v1569_v47 }
0x102e   :  { %v1575_v9 = vadd.f32 1e-12, %v1573_v8 }
0x102f   :  { %v1572_v10 = vpop.xlane.xlu0 %1571 }
0x1030   :  { %2420 = vrsqrt.f32 %v1575_v9  ;;  %v1574_v11 = vmul.f32 0.03125, %v1572_v10 }
0x1032   :  { %v1576_v12 = vadd.f32 1e-12, %v1574_v11 }
0x1034   :  { %2422 = vrsqrt.f32 %v1576_v12 }
0x103d   :  { %v2421_v13 = vpop.eup %2420 }
0x103e   :  { %v1579_v15 = vmul.f32 %v2421_v13, %v1563_v3 }
0x1040   :  { %v1587_v19 = vmul.f32 %v2074_v16, %v1579_v15 }
0x1041   :  { %v2423_v17 = vpop.eup %2422 }
0x1042   :  { %v1580_v18 = vmul.f32 %v2423_v17, %v1564_v31  ;;  %v1595_v22 = vadd.f32 %v2075_v20, %v1587_v19 }
0x1044   :  { %v1588_v21 = vmul.f32 %v2074_v16, %v1580_v18 }
0x1046   :  { %v1596_v23 = vadd.f32 %v2075_v20, %v1588_v21  ;;  %v2102_v21 = vld [vmem:[%s2927_s15 + $0x1] ss:$0 sm:$0xff] }
0x1048   :  { %v1597_v24 = vpack.c.bf16 %v1596_v23, %v1595_v22 }
0x104a   :  { %2304 = vmatmul.mubr.msk.bf16.vlgmr.msra.gmra.mxu1 %vm73_vm0, %v1597_v24 }
0x104b   :  { %2321 = vmatprep.mubr.msk.bf16.mxu1 %vm2435_vm1, %v2434_v14 }
0x110a   :  { %v1660_v30 = vpop.f32.mrf.mxu1 }
0x110b   :  { %v1661_v33 = vadd.f32 %v2081_v29, %v1660_v30  ;;  %v1819_v30 = vld [vmem:[%s2930_s2] sm:$0xf] }
0x110c   :  { %v2305_v34 = vpop.f32.mrf.mxu1 }
0x110d   :  { %v1669_v37 = vmul.f32 0.044715, %v1661_v33  ;;  %v1667_v55 = vmul.f32 0.5, %v1661_v33  ;;  %v2369_v34 = vld [vmem:[%s2929_s17] sm:$0xff]  }
0x110e   :  { %v1663_v38 = vpop.f32.mrf.mxu1 }
0x110f   :  { %v1671_v39 = vmul.f32 %v1669_v37, %v1661_v33  ;;  %v1664_v40 = vadd.f32 %v2081_v29, %v1663_v38 }
0x1110   :  { %v2306_v41 = vpop.f32.mrf.mxu1 }
0x1111   :  { %v1673_v42 = vmul.f32 %v1671_v39, %v1661_v33  ;;  %v1670_v43 = vmul.f32 0.044715, %v1664_v40  ;;  %v1668_v56 = vmul.f32 0.5, %v1664_v40 }
0x1113   :  { %v1675_v44 = vadd.f32 %v1673_v42, %v1661_v33  ;;  %v1672_v45 = vmul.f32 %v1670_v43, %v1664_v40  ;;  %v2368_v33 = vld [vmem:[%s2929_s17 + $0x8] sm:$0xff]   ;;  %v2371_v43 = vld [vmem:[%s2931_s19] sm:$0xff]  }
0x1114   :  { %v2370_v42 = vld [vmem:[%s2931_s19 + $0x8] sm:$0xff]  }
0x1115   :  { %v1677_v46 = vmul.f32 0.7978846, %v1675_v44  ;;  %v1674_v48 = vmul.f32 %v1672_v45, %v1664_v40  ;;  %v2105_v44 = vld [vmem:[%s2932_s18] ss:$0 sm:$0xff] }
0x1117   :  { %2424 = vtanh.f32 %v1677_v46  ;;  %v1676_v49 = vadd.f32 %v1674_v48, %v1664_v40 }
0x1119   :  { %v1678_v51 = vmul.f32 0.7978846, %v1676_v49 }
0x111b   :  { %2426 = vtanh.f32 %v1678_v51 }
0x1124   :  { %v2425_v52 = vpop.eup %2424 }
0x1125   :  { %v1681_v53 = vadd.f32 1.0, %v2425_v52 }
0x1127   :  { %v1683_v58 = vmul.f32 %v1681_v53, %v1667_v55 }
0x1128   :  { %v2427_v54 = vpop.eup %2426 }
0x1129   :  { %v1682_v57 = vadd.f32 1.0, %v2427_v54 }
0x112b   :  { %v1684_v59 = vmul.f32 %v1682_v57, %v1668_v56 }
0x112d   :  { %v1685_v60 = vpack.c.bf16 %v1684_v59, %v1683_v58 }
0x112f   :  { %2316 = vmatmul.mubr.msk.bf16.vlgmr.msra.gmra.mxu0 %vm873_vm3, %v1685_v60 }
0x1130   :  { %2337 = vmatprep.mubr.msk.bf16.mxu0 %vm2435_vm1, %v2434_v14  ;;  %2334 = vmatpush3.bf16.msra.mxu0 %v2370_v42 }
0x1131   :  { %2335 = vmatprep.subr.bf16.mxu0 %v2434_v14 }
0x1134   :  { %2336 = vmatpush3.bf16.msra.mxu0 %v2371_v43 }
0x11ef   :  { %v1764_v62 = vpop.f32.mrf.mxu0 }
0x11f0   :  { %v1765_v63 = vadd.f32 %v2094_v61, %v1764_v62 }
0x11f1   :  { %v2317_v0 = vpop.f32.mrf.mxu0 }
0x11f2   :  { %v1771_v1 = vadd.f32 %v1765_v63, %v1595_v22 }
0x11f3   :  { %v1767_v2 = vpop.f32.mrf.mxu0 }
0x11f4   :  { %v1768_v3 = vadd.f32 %v2094_v61, %v1767_v2  ;;  %v1777_v4 = vsel %vm73_vm0, %v1771_v1, 0.0 }
0x11f5   :  { %1778 = vadd.xlane.f32.xlu0 %v1777_v4  ;;  %v2318_v5 = vpop.f32.mrf.mxu0 }
0x11f6   :  { %v1772_v6 = vadd.f32 %v1768_v3, %v1596_v23 }
0x11f8   :  { %v1780_v31 = vsel %vm73_vm0, %v1772_v6, 0.0 }
0x11f9   :  { %1781 = vadd.xlane.f32.xlu1 %v1780_v31 }
0x127e   :  { %v1779_v7 = vpop.xlane.xlu0 %1778 }
0x127f   :  { %v1783_v35 = vmul.f32 0.03125, %v1779_v7 }
0x1281   :  { %v1785_v32 = vsub.f32 %v1771_v1, %v1783_v35 }
0x1282   :  { %v1782_v36 = vpop.xlane.xlu1 %1781 }
0x1283   :  { %v1784_v50 = vmul.f32 0.03125, %v1782_v36  ;;  %v1787_v47 = vmul.f32 %v1785_v32, %v1785_v32 }
0x1285   :  { %v1786_v8 = vsub.f32 %v1772_v6, %v1784_v50  ;;  %v1789_v9 = vsel %vm73_vm0, %v1787_v47, 0.0 }
0x1286   :  { %1790 = vadd.xlane.f32.xlu0 %v1789_v9 }
0x1287   :  { %v1788_v10 = vmul.f32 %v1786_v8, %v1786_v8 }
0x1289   :  { %v1792_v11 = vsel %vm73_vm0, %v1788_v10, 0.0 }
0x128a   :  { %1793 = vadd.xlane.f32.xlu1 %v1792_v11 }
0x130f   :  { %v1791_v12 = vpop.xlane.xlu0 %1790 }
0x1310   :  { %v1795_v13 = vmul.f32 0.03125, %v1791_v12 }
0x1312   :  { %v1797_v15 = vadd.f32 1e-12, %v1795_v13 }
0x1313   :  { %v1794_v16 = vpop.xlane.xlu1 %1793 }
0x1314   :  { %2428 = vrsqrt.f32 %v1797_v15  ;;  %v1796_v17 = vmul.f32 0.03125, %v1794_v16 }
0x1316   :  { %v1798_v18 = vadd.f32 1e-12, %v1796_v17 }
0x1318   :  { %2430 = vrsqrt.f32 %v1798_v18 }
0x1321   :  { %v2429_v19 = vpop.eup %2428 }
0x1322   :  { %v1801_v20 = vmul.f32 %v2429_v19, %v1785_v32 }
0x1324   :  { %v1809_v24 = vmul.f32 %v2102_v21, %v1801_v20 }
0x1325   :  { %v2431_v22 = vpop.eup %2430 }
0x1326   :  { %v1802_v23 = vmul.f32 %v2431_v22, %v1786_v8  ;;  %v1817_v27 = vadd.f32 %v2103_v25, %v1809_v24 }
0x1328   :  { %v1810_v26 = vmul.f32 %v2102_v21, %v1802_v23 }
0x132a   :  { %v1818_v28 = vadd.f32 %v2103_v25, %v1810_v26 }
0x132c   :  { %v1820_v29 = vpack.c.bf16 %v1818_v28, %v1817_v27 }
0x132e   :  { %2320 = vmatpush3.bf16.msra.mxu1 %v1820_v29 }
0x132f   :  { %2325 = vmatprep.subr.bf16.mxu1 %v2434_v14 }
0x1331   :  { %2322 = vmatmul.mubr.msk.bf16.vlgmr.msra.gmra.mxu1 %vm197_vm2, %v1819_v30 }
0x1332   :  { %2326 = vmatpush3.bf16.msra.mxu1 %v2368_v33  ;;  %2329 = vmatprep.mubr.msk.bf16.mxu1 %vm2435_vm1, %v2434_v14 }
0x1333   :  { %2327 = vmatprep.subr.bf16.mxu1 %v2434_v14  ;;  %v2109_v14 = vld [vmem:[%s2933_s20] ss:$0 sm:$0xff] }
0x1336   :  { %2328 = vmatpush3.bf16.msra.mxu1 %v2369_v34 }
0x13f1   :  { %v1858_v37 = vpop.f32.mrf.mxu1 }
0x13f2   :  { %v1864_v38 = vpack.c.bf16 %v1858_v37, %v1858_v37 }
0x13f3   :  { %v2323_v39 = vpop.f32.mrf.mxu1 }
0x13f4   :  { %2330 = vmatmul.mubr.msk.bf16.vlgmr.msra.gmra.mxu1 %vm73_vm0, %v1864_v38 }
0x13f5   :  { %v1861_v40 = vpop.f32.mrf.mxu1 }
0x13f7   :  { %v2324_v41 = vpop.f32.mrf.mxu1 }
0x14b4   :  { %v1925_v45 = vpop.f32.mrf.mxu1 }
0x14b5   :  { %v1926_v46 = vadd.f32 %v2105_v44, %v1925_v45 }
0x14b6   :  { %v2331_v48 = vpop.f32.mrf.mxu1 }
0x14b7   :  { %2432 = vtanh.f32 %v1926_v46 }
0x14b8   :  { %v1928_v49 = vpop.f32.mrf.mxu1 }
0x14ba   :  { %v2332_v51 = vpop.f32.mrf.mxu1 }
0x14c4   :  { %v2433_v52 = vpop.eup %2432 }
0x14c5   :  { %v1932_v53 = vpack.c.bf16 %v2433_v52, %v2433_v52 }
0x14c7   :  { %2338 = vmatmul.mubr.msk.bf16.vlgmr.msra.gmra.mxu0 %vm73_vm0, %v1932_v53 }
0x1587   :  { %v1993_v54 = vpop.f32.mrf.mxu0 }
0x1588   :  { %v1994_v55 = vadd.f32 %v2109_v14, %v1993_v54 }
0x1589   :  { %v2339_v56 = vpop.f32.mrf.mxu0 }
0x158a   :  { %1999 = vst [vmem:[%s2934_s21] sm:$0xff] %v1994_v55 }
0x158b   :  { %v1996_v57 = vpop.f32.mrf.mxu0 }
0x158d   :  { %v2340_v58 = vpop.f32.mrf.mxu0 }

</bundles_post_ra>
